<compile_context>
chip_gen: v7x
topology: tpu7x:2x2x1
jax: 0.10.0
libtpu: 0.0.40
codegen_flags: <defaults>
</compile_context>

<pallas_src>
import functools
import math

import jax
import jax.numpy as jnp
from jax import lax
from jax.experimental import pallas as pl
from jax.experimental.pallas import tpu as pltpu


# --------------------------------------------------------------------------
# In-kernel helpers (VMEM-resident values; batch folded into rows)
# --------------------------------------------------------------------------

def _layernorm(x, gamma, beta, eps=1e-5):
    mean = jnp.mean(x, axis=-1, keepdims=True)
    var = jnp.mean((x - mean) ** 2, axis=-1, keepdims=True)
    return (x - mean) * lax.rsqrt(var + eps) * gamma + beta


def _mm(a, w, b):
    """bf16 x bf16 MXU matmul with f32 accumulation, plus f32 bias."""
    return jnp.dot(a.astype(jnp.bfloat16), w, preferred_element_type=jnp.float32) + b


def _sq_attention(qp, kp, vp, seg_eh, seg_he):
    """Exact single-query multi-head attention, all heads & batch fused.

    qp: (B, E) query projection (1/sqrt(dh) already folded into W_q).
    kp, vp: (B, Lk, E).  seg_eh (E, H) / seg_he (H, E) are constant 0/1 matrices
    routing features <-> heads, so per-head score reduction and the head-broadcast
    of the probabilities are two small MXU matmuls (no per-head loop of
    lane-sliced tiny matmuls).  Returns the head-concatenated context (B, E).
    """
    B, Lk, E = kp.shape
    H = seg_eh.shape[1]
    prod = (qp[:, None, :] * kp).astype(jnp.bfloat16)                      # (B, Lk, E)
    s = jnp.dot(prod.reshape(B * Lk, E), seg_eh,
                preferred_element_type=jnp.float32).reshape(B, Lk, H)      # per-head logits
    s = s - jnp.max(s, axis=1, keepdims=True)
    e = jnp.exp(s)
    p = e * pl.reciprocal(jnp.sum(e, axis=1, keepdims=True), approx=True)  # (B, Lk, H)
    pe = jnp.dot(p.reshape(B * Lk, H).astype(jnp.bfloat16), seg_he,
                 preferred_element_type=jnp.float32).reshape(B, Lk, E)     # p per feature
    return jnp.sum(pe * vp, axis=1)                                        # (B, E)


# --------------------------------------------------------------------------
# Fully fused decoder kernel (one pallas_call per forward pass)
# --------------------------------------------------------------------------

def _decoder_kernel(
        x_ref, enc_ref, seg_eh_ref, seg_he_ref,
        sa_wqkv_ref, sa_bqkv_ref, sa_wo_ref, sa_bo_ref, sa_g_ref, sa_b_ref,
        ca_wq_ref, ca_bq_ref, ca_wkv_ref, ca_bkv_ref, ca_wo_ref, ca_bo_ref,
        ca_g_ref, ca_b_ref,
        ff_w1_ref, ff_b1_ref, ff_w2_ref, ff_b2_ref, ff_g_ref, ff_b_ref,
        vw_ref, vb_ref,
        out_ref):
    B, S, E = x_ref.shape
    num_blocks = ca_wq_ref.shape[0]

    seg_eh = seg_eh_ref[...]                                   # (E, H) bf16
    seg_he = seg_he_ref[...]                                   # (H, E) bf16

    x = x_ref[...]                                             # (B, S, E) f32
    enc2d = enc_ref[...].reshape(B * S, E).astype(jnp.bfloat16)  # reused by every block

    h = None                                                   # running (B, E) token state
    for i in range(num_blocks):                                # static unroll
        # -------- shared self-attention: MHA(q=x[:,-1:], kv=x, residual=x[:,-1:]) ----
        if i == 0:
            # Query is the last row of the same x projected for K/V: one fused
            # (B*S, E) @ (E, 3E) projection serves Q, K and V.
            qkv = _mm(x.reshape(B * S, E), sa_wqkv_ref[...],
                      sa_bqkv_ref[...]).reshape(B, S, 3 * E)
            ctx = _sq_attention(qkv[:, S - 1, :E], qkv[:, :, E:2 * E],
                                qkv[:, :, 2 * E:], seg_eh, seg_he)        # (B, E)
            resid = x[:, S - 1, :]                                        # (B, E)
        else:
            # x is now a single token: softmax over one key is exactly 1, so the
            # attention output is just the value projection of x.
            ctx = _mm(h, sa_wqkv_ref[...], sa_bqkv_ref[...])[:, 2 * E:]   # (B, E)
            resid = h
        attn = _mm(ctx, sa_wo_ref[...], sa_bo_ref[...])
        h = _layernorm(attn + resid, sa_g_ref[...], sa_b_ref[...])        # (B, E)

        # -------- block i: cross-attention over encoder outputs --------
        qp = _mm(h, ca_wq_ref[i], ca_bq_ref[i])                           # (B, E) pre-scaled
        kvp = _mm(enc2d, ca_wkv_ref[i], ca_bkv_ref[i]).reshape(B, S, 2 * E)
        ctx = _sq_attention(qp, kvp[:, :, :E], kvp[:, :, E:], seg_eh, seg_he)
        attn = _mm(ctx, ca_wo_ref[i], ca_bo_ref[i])
        h = _layernorm(attn + h, ca_g_ref[i], ca_b_ref[i])

        # -------- block i: feed-forward --------
        ff = jnp.maximum(_mm(h, ff_w1_ref[i], ff_b1_ref[i]), 0.0)         # (B, 4E)
        ff = _mm(ff, ff_w2_ref[i], ff_b2_ref[i])                          # (B, E)
        h = _layernorm(ff + h, ff_g_ref[i], ff_b_ref[i])

    # -------- vocab logits + log_softmax (V padded to a lane-dense multiple of 128) --
    y = _mm(h, vw_ref[...], vb_ref[...])                                  # (B, Vpad)
    y = y - jnp.max(y, axis=-1, keepdims=True)
    out_ref[...] = y - jnp.log(jnp.sum(jnp.exp(y), axis=-1, keepdims=True))


# --------------------------------------------------------------------------
# pallas_call wrapper
# --------------------------------------------------------------------------

_PARAM_ORDER = ("seg_eh", "seg_he",
                "sa_wqkv", "sa_bqkv", "sa_wo", "sa_bo", "sa_g", "sa_b",
                "ca_wq", "ca_bq", "ca_wkv", "ca_bkv", "ca_wo", "ca_bo", "ca_g", "ca_b",
                "ff_w1", "ff_b1", "ff_w2", "ff_b2", "ff_g", "ff_b",
                "vocab_w", "vocab_b")


def decoder_forward(params, encoder_outs, x, *, vocab_size):
    """Fused forward of the PyTorch Decoder.  x, encoder_outs: (B, S, E) f32.
    Returns (B, 1, vocab_size) log-probabilities."""
    B, S, E = x.shape
    vpad = params["vocab_w"].shape[1]
    args = (x, encoder_outs) + tuple(params[k] for k in _PARAM_ORDER)
    vmem = pl.BlockSpec(memory_space=pltpu.MemorySpace.VMEM)   # whole array, VMEM-resident
    out = pl.pallas_call(
        _decoder_kernel,
        out_shape=jax.ShapeDtypeStruct((B, vpad), jnp.float32),
        in_specs=[vmem] * len(args),
        out_specs=vmem,
    )(*args)
    return out[:, None, :vocab_size]


# --------------------------------------------------------------------------
# Parameter init (matmul weights bf16, biases / LN params f32)
# --------------------------------------------------------------------------

def _init_linear(key, d_in, d_out, scale=0.02):
    w = scale * jax.random.normal(key, (d_in, d_out), jnp.float32)
    b = jnp.zeros((1, d_out), jnp.float32)
    return w, b


def _init_mha(key, embed_dim, num_heads):
    """Raw (f32) MHA weights; 1/sqrt(dh) query scale folded into W_q / b_q."""
    kq, kk, kv, ko = jax.random.split(key, 4)
    scale = 1.0 / math.sqrt(embed_dim // num_heads)
    wq, bq = _init_linear(kq, embed_dim, embed_dim)
    wk, bk = _init_linear(kk, embed_dim, embed_dim)
    wv, bv = _init_linear(kv, embed_dim, embed_dim)
    wo, bo = _init_linear(ko, embed_dim, embed_dim)
    return dict(wq=wq * scale, bq=bq * scale, wk=wk, bk=bk, wv=wv, bv=bv,
                wo=wo, bo=bo,
                ln_g=jnp.ones((1, embed_dim), jnp.float32),
                ln_b=jnp.zeros((1, embed_dim), jnp.float32))


def init_decoder_params(key, embed_dim, num_heads, num_blocks, vocab_size):
    hidden_dim = 4 * embed_dim
    dh = embed_dim // num_heads
    keys = jax.random.split(key, 2 * num_blocks + 2)

    # Shared self-attention module (one instance reused every block iteration, like
    # the PyTorch module).  W_q fused into a single (E, 3E) W_qkv.
    sa = _init_mha(keys[0], embed_dim, num_heads)
    sa_wqkv = jnp.concatenate([sa["wq"], sa["wk"], sa["wv"]], axis=1)
    sa_bqkv = jnp.concatenate([sa["bq"], sa["bk"], sa["bv"]], axis=1)

    # Per-block cross-attention + FFN, stacked on a leading block axis.
    ca, ff = [], []
    for i in range(num_blocks):
        a = _init_mha(keys[1 + 2 * i], embed_dim, num_heads)
        w1, b1 = _init_linear(jax.random.fold_in(keys[2 + 2 * i], 0), embed_dim, hidden_dim)
        w2, b2 = _init_linear(jax.random.fold_in(keys[2 + 2 * i], 1), hidden_dim, embed_dim)
        ca.append(a)
        ff.append(dict(w1=w1, b1=b1, w2=w2, b2=b2,
                       ln_g=jnp.ones((1, embed_dim), jnp.float32),
                       ln_b=jnp.zeros((1, embed_dim), jnp.float32)))

    def stack(dicts, name, dtype=None):
        arr = jnp.stack([d[name] for d in dicts])
        return arr.astype(dtype) if dtype is not None else arr

    # Vocab projection, lane-padded to a multiple of 128 (weights zero-padded, bias
    # padded with -1e30 so padded logits vanish from the log-softmax; sliced outside).
    wv, bv = _init_linear(keys[-1], embed_dim, vocab_size)
    vpad = ((vocab_size + 127) // 128) * 128
    wv = jnp.pad(wv, ((0, 0), (0, vpad - vocab_size)))
    bv = jnp.pad(bv, ((0, 0), (0, vpad - vocab_size)), constant_values=-1e30)

    # Constant head-segment routing matrices: seg_he[h, e] = 1 iff feature e in head h.
    seg_he = jnp.repeat(jnp.eye(num_heads, dtype=jnp.float32), dh, axis=1)   # (H, E)

    bf16 = jnp.bfloat16
    return {
        "seg_eh": seg_he.T.astype(bf16), "seg_he": seg_he.astype(bf16),
        "sa_wqkv": sa_wqkv.astype(bf16), "sa_bqkv": sa_bqkv,
        "sa_wo": sa["wo"].astype(bf16), "sa_bo": sa["bo"],
        "sa_g": sa["ln_g"], "sa_b": sa["ln_b"],
        "ca_wq": stack(ca, "wq", bf16), "ca_bq": stack(ca, "bq"),
        "ca_wkv": jnp.stack([jnp.concatenate([a["wk"], a["wv"]], axis=1)
                             for a in ca]).astype(bf16),
        "ca_bkv": jnp.stack([jnp.concatenate([a["bk"], a["bv"]], axis=1) for a in ca]),
        "ca_wo": stack(ca, "wo", bf16), "ca_bo": stack(ca, "bo"),
        "ca_g": stack(ca, "ln_g"), "ca_b": stack(ca, "ln_b"),
        "ff_w1": stack(ff, "w1", bf16), "ff_b1": stack(ff, "b1"),
        "ff_w2": stack(ff, "w2", bf16), "ff_b2": stack(ff, "b2"),
        "ff_g": stack(ff, "ln_g"), "ff_b": stack(ff, "ln_b"),
        "vocab_w": wv.astype(bf16), "vocab_b": bv,
    }


# --------------------------------------------------------------------------

if __name__ == "__main__":
    embed_dim, num_heads = 32, 4
    num_landmarks = 4      # interface parity only: with Lq == 1 the Nystrom
                           # approximation is exact softmax attention (landmarks unused)
    num_blocks, vocab_size = 2, 50
    B, S = 2, 8

    root = jax.random.PRNGKey(0)
    k_params, k_enc, k_x = jax.random.split(root, 3)

    params = init_decoder_params(k_params, embed_dim, num_heads, num_blocks, vocab_size)
    encoder_outs = jax.random.normal(k_enc, (B, S, embed_dim), jnp.float32)
    x = jax.random.normal(k_x, (B, S, embed_dim), jnp.float32)

    fwd = jax.jit(functools.partial(decoder_forward, vocab_size=vocab_size))
    out = jax.block_until_ready(fwd(params, encoder_outs, x))

    assert out.shape == (B, 1, vocab_size), out.shape
    assert bool(jnp.all(jnp.isfinite(out)))
    print("KERNEL_OK")
</pallas_src>

<mosaic_0001>
module attributes {stable_mosaic.version = 11 : i64} {
  func.func @_decoder_kernel(%arg0: memref<2x8x32xf32, #tpu.memory_space<vmem>>, %arg1: memref<2x8x32xf32, #tpu.memory_space<vmem>>, %arg2: memref<32x4xbf16, #tpu.memory_space<vmem>>, %arg3: memref<4x32xbf16, #tpu.memory_space<vmem>>, %arg4: memref<32x96xbf16, #tpu.memory_space<vmem>>, %arg5: memref<1x96xf32, #tpu.memory_space<vmem>>, %arg6: memref<32x32xbf16, #tpu.memory_space<vmem>>, %arg7: memref<1x32xf32, #tpu.memory_space<vmem>>, %arg8: memref<1x32xf32, #tpu.memory_space<vmem>>, %arg9: memref<1x32xf32, #tpu.memory_space<vmem>>, %arg10: memref<2x32x32xbf16, #tpu.memory_space<vmem>>, %arg11: memref<2x1x32xf32, #tpu.memory_space<vmem>>, %arg12: memref<2x32x64xbf16, #tpu.memory_space<vmem>>, %arg13: memref<2x1x64xf32, #tpu.memory_space<vmem>>, %arg14: memref<2x32x32xbf16, #tpu.memory_space<vmem>>, %arg15: memref<2x1x32xf32, #tpu.memory_space<vmem>>, %arg16: memref<2x1x32xf32, #tpu.memory_space<vmem>>, %arg17: memref<2x1x32xf32, #tpu.memory_space<vmem>>, %arg18: memref<2x32x128xbf16, #tpu.memory_space<vmem>>, %arg19: memref<2x1x128xf32, #tpu.memory_space<vmem>>, %arg20: memref<2x128x32xbf16, #tpu.memory_space<vmem>>, %arg21: memref<2x1x32xf32, #tpu.memory_space<vmem>>, %arg22: memref<2x1x32xf32, #tpu.memory_space<vmem>>, %arg23: memref<2x1x32xf32, #tpu.memory_space<vmem>>, %arg24: memref<32x128xbf16, #tpu.memory_space<vmem>>, %arg25: memref<1x128xf32, #tpu.memory_space<vmem>>, %arg26: memref<2x128xf32, #tpu.memory_space<vmem>>) attributes {dimension_semantics = [], scalar_prefetch = 0 : i64, scratch_operands = 0 : i64, tpu.core_type = #tpu.core_type<tc>} {
    %c0 = arith.constant 0 : index
    %c0_0 = arith.constant 0 : index
    %0 = vector.load %arg2[%c0, %c0_0] : memref<32x4xbf16, #tpu.memory_space<vmem>>, vector<32x4xbf16>
    %c0_1 = arith.constant 0 : index
    %c0_2 = arith.constant 0 : index
    %1 = vector.load %arg3[%c0_1, %c0_2] : memref<4x32xbf16, #tpu.memory_space<vmem>>, vector<4x32xbf16>
    %c0_3 = arith.constant 0 : index
    %c0_4 = arith.constant 0 : index
    %c0_5 = arith.constant 0 : index
    %2 = vector.load %arg0[%c0_3, %c0_4, %c0_5] : memref<2x8x32xf32, #tpu.memory_space<vmem>>, vector<2x8x32xf32>
    %c0_6 = arith.constant 0 : index
    %c0_7 = arith.constant 0 : index
    %c0_8 = arith.constant 0 : index
    %3 = vector.load %arg1[%c0_6, %c0_7, %c0_8] : memref<2x8x32xf32, #tpu.memory_space<vmem>>, vector<2x8x32xf32>
    %4 = vector.shape_cast %3 : vector<2x8x32xf32> to vector<16x32xf32>
    %5 = arith.truncf %4 : vector<16x32xf32> to vector<16x32xbf16>
    %6 = vector.shape_cast %2 : vector<2x8x32xf32> to vector<16x32xf32>
    %c0_9 = arith.constant 0 : index
    %c0_10 = arith.constant 0 : index
    %7 = vector.load %arg4[%c0_9, %c0_10] : memref<32x96xbf16, #tpu.memory_space<vmem>>, vector<32x96xbf16>
    %c0_11 = arith.constant 0 : index
    %c0_12 = arith.constant 0 : index
    %8 = vector.load %arg5[%c0_11, %c0_12] : memref<1x96xf32, #tpu.memory_space<vmem>>, vector<1x96xf32>
    %9 = arith.truncf %6 : vector<16x32xf32> to vector<16x32xbf16>
    %cst = arith.constant dense<0.000000e+00> : vector<16x96xf32>
    %10 = tpu.matmul %9, %7, %cst {dimension_numbers = #tpu.dot_dimension_numbers<[1], [0], [0], [1], [0, 0, 1, 1], [], []>} : vector<16x32xbf16>, vector<32x96xbf16>, vector<16x96xf32> -> vector<16x96xf32>
    %11 = vector.broadcast %8 : vector<1x96xf32> to vector<16x96xf32>
    %12 = arith.addf %10, %11 : vector<16x96xf32>
    %13 = vector.shape_cast %12 : vector<16x96xf32> to vector<2x8x96xf32>
    %14 = vector.extract_strided_slice %13 {offsets = [0, 7, 0], sizes = [2, 1, 32], strides = [1, 1, 1]} : vector<2x8x96xf32> to vector<2x1x32xf32>
    %15 = vector.shape_cast %14 : vector<2x1x32xf32> to vector<2x32xf32>
    %16 = vector.extract_strided_slice %13 {offsets = [0, 0, 32], sizes = [2, 8, 32], strides = [1, 1, 1]} : vector<2x8x96xf32> to vector<2x8x32xf32>
    %17 = vector.extract_strided_slice %13 {offsets = [0, 0, 64], sizes = [2, 8, 32], strides = [1, 1, 1]} : vector<2x8x96xf32> to vector<2x8x32xf32>
    %18 = vector.shape_cast %15 : vector<2x32xf32> to vector<2x1x32xf32>
    %19 = vector.broadcast %18 : vector<2x1x32xf32> to vector<2x8x32xf32>
    %20 = arith.mulf %19, %16 : vector<2x8x32xf32>
    %21 = arith.truncf %20 : vector<2x8x32xf32> to vector<2x8x32xbf16>
    %22 = vector.shape_cast %21 : vector<2x8x32xbf16> to vector<16x32xbf16>
    %cst_13 = arith.constant dense<0.000000e+00> : vector<16x4xf32>
    %23 = tpu.matmul %22, %0, %cst_13 {dimension_numbers = #tpu.dot_dimension_numbers<[1], [0], [0], [1], [0, 0, 1, 1], [], []>} : vector<16x32xbf16>, vector<32x4xbf16>, vector<16x4xf32> -> vector<16x4xf32>
    %24 = vector.shape_cast %23 : vector<16x4xf32> to vector<2x8x4xf32>
    %cst_14 = arith.constant dense<0xFF800000> : vector<2x4xf32>
    %25 = vector.multi_reduction <maximumf>, %24, %cst_14 [1] : vector<2x8x4xf32> to vector<2x4xf32>
    %26 = vector.shape_cast %25 : vector<2x4xf32> to vector<2x1x4xf32>
    %27 = vector.broadcast %26 : vector<2x1x4xf32> to vector<2x8x4xf32>
    %28 = arith.subf %24, %27 : vector<2x8x4xf32>
    %29 = math.exp %28 : vector<2x8x4xf32>
    %cst_15 = arith.constant dense<0.000000e+00> : vector<2x4xf32>
    %30 = vector.multi_reduction <add>, %29, %cst_15 [1] : vector<2x8x4xf32> to vector<2x4xf32>
    %31 = vector.shape_cast %30 : vector<2x4xf32> to vector<2x1x4xf32>
    %32 = tpu.reciprocal %31 {approx = true} : vector<2x1x4xf32> -> vector<2x1x4xf32>
    %33 = vector.broadcast %32 : vector<2x1x4xf32> to vector<2x8x4xf32>
    %34 = arith.mulf %29, %33 : vector<2x8x4xf32>
    %35 = vector.shape_cast %34 : vector<2x8x4xf32> to vector<16x4xf32>
    %36 = arith.truncf %35 : vector<16x4xf32> to vector<16x4xbf16>
    %cst_16 = arith.constant dense<0.000000e+00> : vector<16x32xf32>
    %37 = tpu.matmul %36, %1, %cst_16 {dimension_numbers = #tpu.dot_dimension_numbers<[1], [0], [0], [1], [0, 0, 1, 1], [], []>} : vector<16x4xbf16>, vector<4x32xbf16>, vector<16x32xf32> -> vector<16x32xf32>
    %38 = vector.shape_cast %37 : vector<16x32xf32> to vector<2x8x32xf32>
    %39 = arith.mulf %38, %17 : vector<2x8x32xf32>
    %cst_17 = arith.constant dense<0.000000e+00> : vector<2x32xf32>
    %40 = vector.multi_reduction <add>, %39, %cst_17 [1] : vector<2x8x32xf32> to vector<2x32xf32>
    %41 = vector.extract_strided_slice %2 {offsets = [0, 7, 0], sizes = [2, 1, 32], strides = [1, 1, 1]} : vector<2x8x32xf32> to vector<2x1x32xf32>
    %42 = vector.shape_cast %41 : vector<2x1x32xf32> to vector<2x32xf32>
    %c0_18 = arith.constant 0 : index
    %c0_19 = arith.constant 0 : index
    %43 = vector.load %arg6[%c0_18, %c0_19] : memref<32x32xbf16, #tpu.memory_space<vmem>>, vector<32x32xbf16>
    %c0_20 = arith.constant 0 : index
    %c0_21 = arith.constant 0 : index
    %44 = vector.load %arg7[%c0_20, %c0_21] : memref<1x32xf32, #tpu.memory_space<vmem>>, vector<1x32xf32>
    %45 = arith.truncf %40 : vector<2x32xf32> to vector<2x32xbf16>
    %cst_22 = arith.constant dense<0.000000e+00> : vector<2x32xf32>
    %46 = tpu.matmul %45, %43, %cst_22 {dimension_numbers = #tpu.dot_dimension_numbers<[1], [0], [0], [1], [0, 0, 1, 1], [], []>} : vector<2x32xbf16>, vector<32x32xbf16>, vector<2x32xf32> -> vector<2x32xf32>
    %47 = vector.broadcast %44 : vector<1x32xf32> to vector<2x32xf32>
    %48 = arith.addf %46, %47 : vector<2x32xf32>
    %49 = arith.addf %48, %42 : vector<2x32xf32>
    %c0_23 = arith.constant 0 : index
    %c0_24 = arith.constant 0 : index
    %50 = vector.load %arg8[%c0_23, %c0_24] : memref<1x32xf32, #tpu.memory_space<vmem>>, vector<1x32xf32>
    %c0_25 = arith.constant 0 : index
    %c0_26 = arith.constant 0 : index
    %51 = vector.load %arg9[%c0_25, %c0_26] : memref<1x32xf32, #tpu.memory_space<vmem>>, vector<1x32xf32>
    %cst_27 = arith.constant dense<0.000000e+00> : vector<2xf32>
    %52 = vector.multi_reduction <add>, %49, %cst_27 [1] : vector<2x32xf32> to vector<2xf32>
    %53 = vector.shape_cast %52 : vector<2xf32> to vector<2x1xf32>
    %cst_28 = arith.constant 3.200000e+01 : f32
    %54 = vector.broadcast %cst_28 : f32 to vector<2x1xf32>
    %55 = arith.divf %53, %54 : vector<2x1xf32>
    %56 = vector.broadcast %55 : vector<2x1xf32> to vector<2x32xf32>
    %57 = arith.subf %49, %56 : vector<2x32xf32>
    %58 = arith.mulf %57, %57 : vector<2x32xf32>
    %cst_29 = arith.constant dense<0.000000e+00> : vector<2xf32>
    %59 = vector.multi_reduction <add>, %58, %cst_29 [1] : vector<2x32xf32> to vector<2xf32>
    %60 = vector.shape_cast %59 : vector<2xf32> to vector<2x1xf32>
    %cst_30 = arith.constant 3.200000e+01 : f32
    %61 = vector.broadcast %cst_30 : f32 to vector<2x1xf32>
    %62 = arith.divf %60, %61 : vector<2x1xf32>
    %63 = vector.broadcast %55 : vector<2x1xf32> to vector<2x32xf32>
    %64 = arith.subf %49, %63 : vector<2x32xf32>
    %cst_31 = arith.constant 9.99999974E-6 : f32
    %65 = vector.broadcast %cst_31 : f32 to vector<2x1xf32>
    %66 = arith.addf %62, %65 : vector<2x1xf32>
    %67 = math.rsqrt %66 : vector<2x1xf32>
    %68 = vector.broadcast %67 : vector<2x1xf32> to vector<2x32xf32>
    %69 = arith.mulf %64, %68 : vector<2x32xf32>
    %70 = vector.broadcast %50 : vector<1x32xf32> to vector<2x32xf32>
    %71 = arith.mulf %69, %70 : vector<2x32xf32>
    %72 = vector.broadcast %51 : vector<1x32xf32> to vector<2x32xf32>
    %73 = arith.addf %71, %72 : vector<2x32xf32>
    %c0_32 = arith.constant 0 : index
    %c0_33 = arith.constant 0 : index
    %c0_34 = arith.constant 0 : index
    %74 = vector.load %arg10[%c0_32, %c0_33, %c0_34] : memref<2x32x32xbf16, #tpu.memory_space<vmem>>, vector<1x32x32xbf16>
    %75 = vector.shape_cast %74 : vector<1x32x32xbf16> to vector<32x32xbf16>
    %c0_35 = arith.constant 0 : index
    %c0_36 = arith.constant 0 : index
    %c0_37 = arith.constant 0 : index
    %76 = vector.load %arg11[%c0_35, %c0_36, %c0_37] : memref<2x1x32xf32, #tpu.memory_space<vmem>>, vector<1x1x32xf32>
    %77 = vector.shape_cast %76 : vector<1x1x32xf32> to vector<1x32xf32>
    %78 = arith.truncf %73 : vector<2x32xf32> to vector<2x32xbf16>
    %cst_38 = arith.constant dense<0.000000e+00> : vector<2x32xf32>
    %79 = tpu.matmul %78, %75, %cst_38 {dimension_numbers = #tpu.dot_dimension_numbers<[1], [0], [0], [1], [0, 0, 1, 1], [], []>} : vector<2x32xbf16>, vector<32x32xbf16>, vector<2x32xf32> -> vector<2x32xf32>
    %80 = vector.broadcast %77 : vector<1x32xf32> to vector<2x32xf32>
    %81 = arith.addf %79, %80 : vector<2x32xf32>
    %c0_39 = arith.constant 0 : index
    %c0_40 = arith.constant 0 : index
    %c0_41 = arith.constant 0 : index
    %82 = vector.load %arg12[%c0_39, %c0_40, %c0_41] : memref<2x32x64xbf16, #tpu.memory_space<vmem>>, vector<1x32x64xbf16>
    %83 = vector.shape_cast %82 : vector<1x32x64xbf16> to vector<32x64xbf16>
    %c0_42 = arith.constant 0 : index
    %c0_43 = arith.constant 0 : index
    %c0_44 = arith.constant 0 : index
    %84 = vector.load %arg13[%c0_42, %c0_43, %c0_44] : memref<2x1x64xf32, #tpu.memory_space<vmem>>, vector<1x1x64xf32>
    %85 = vector.shape_cast %84 : vector<1x1x64xf32> to vector<1x64xf32>
    %cst_45 = arith.constant dense<0.000000e+00> : vector<16x64xf32>
    %86 = tpu.matmul %5, %83, %cst_45 {dimension_numbers = #tpu.dot_dimension_numbers<[1], [0], [0], [1], [0, 0, 1, 1], [], []>} : vector<16x32xbf16>, vector<32x64xbf16>, vector<16x64xf32> -> vector<16x64xf32>
    %87 = vector.broadcast %85 : vector<1x64xf32> to vector<16x64xf32>
    %88 = arith.addf %86, %87 : vector<16x64xf32>
    %89 = vector.shape_cast %88 : vector<16x64xf32> to vector<2x8x64xf32>
    %90 = vector.extract_strided_slice %89 {offsets = [0, 0, 0], sizes = [2, 8, 32], strides = [1, 1, 1]} : vector<2x8x64xf32> to vector<2x8x32xf32>
    %91 = vector.extract_strided_slice %89 {offsets = [0, 0, 32], sizes = [2, 8, 32], strides = [1, 1, 1]} : vector<2x8x64xf32> to vector<2x8x32xf32>
    %92 = vector.shape_cast %81 : vector<2x32xf32> to vector<2x1x32xf32>
    %93 = vector.broadcast %92 : vector<2x1x32xf32> to vector<2x8x32xf32>
    %94 = arith.mulf %93, %90 : vector<2x8x32xf32>
    %95 = arith.truncf %94 : vector<2x8x32xf32> to vector<2x8x32xbf16>
    %96 = vector.shape_cast %95 : vector<2x8x32xbf16> to vector<16x32xbf16>
    %cst_46 = arith.constant dense<0.000000e+00> : vector<16x4xf32>
    %97 = tpu.matmul %96, %0, %cst_46 {dimension_numbers = #tpu.dot_dimension_numbers<[1], [0], [0], [1], [0, 0, 1, 1], [], []>} : vector<16x32xbf16>, vector<32x4xbf16>, vector<16x4xf32> -> vector<16x4xf32>
    %98 = vector.shape_cast %97 : vector<16x4xf32> to vector<2x8x4xf32>
    %cst_47 = arith.constant dense<0xFF800000> : vector<2x4xf32>
    %99 = vector.multi_reduction <maximumf>, %98, %cst_47 [1] : vector<2x8x4xf32> to vector<2x4xf32>
    %100 = vector.shape_cast %99 : vector<2x4xf32> to vector<2x1x4xf32>
    %101 = vector.broadcast %100 : vector<2x1x4xf32> to vector<2x8x4xf32>
    %102 = arith.subf %98, %101 : vector<2x8x4xf32>
    %103 = math.exp %102 : vector<2x8x4xf32>
    %cst_48 = arith.constant dense<0.000000e+00> : vector<2x4xf32>
    %104 = vector.multi_reduction <add>, %103, %cst_48 [1] : vector<2x8x4xf32> to vector<2x4xf32>
    %105 = vector.shape_cast %104 : vector<2x4xf32> to vector<2x1x4xf32>
    %106 = tpu.reciprocal %105 {approx = true} : vector<2x1x4xf32> -> vector<2x1x4xf32>
    %107 = vector.broadcast %106 : vector<2x1x4xf32> to vector<2x8x4xf32>
    %108 = arith.mulf %103, %107 : vector<2x8x4xf32>
    %109 = vector.shape_cast %108 : vector<2x8x4xf32> to vector<16x4xf32>
    %110 = arith.truncf %109 : vector<16x4xf32> to vector<16x4xbf16>
    %cst_49 = arith.constant dense<0.000000e+00> : vector<16x32xf32>
    %111 = tpu.matmul %110, %1, %cst_49 {dimension_numbers = #tpu.dot_dimension_numbers<[1], [0], [0], [1], [0, 0, 1, 1], [], []>} : vector<16x4xbf16>, vector<4x32xbf16>, vector<16x32xf32> -> vector<16x32xf32>
    %112 = vector.shape_cast %111 : vector<16x32xf32> to vector<2x8x32xf32>
    %113 = arith.mulf %112, %91 : vector<2x8x32xf32>
    %cst_50 = arith.constant dense<0.000000e+00> : vector<2x32xf32>
    %114 = vector.multi_reduction <add>, %113, %cst_50 [1] : vector<2x8x32xf32> to vector<2x32xf32>
    %c0_51 = arith.constant 0 : index
    %c0_52 = arith.constant 0 : index
    %c0_53 = arith.constant 0 : index
    %115 = vector.load %arg14[%c0_51, %c0_52, %c0_53] : memref<2x32x32xbf16, #tpu.memory_space<vmem>>, vector<1x32x32xbf16>
    %116 = vector.shape_cast %115 : vector<1x32x32xbf16> to vector<32x32xbf16>
    %c0_54 = arith.constant 0 : index
    %c0_55 = arith.constant 0 : index
    %c0_56 = arith.constant 0 : index
    %117 = vector.load %arg15[%c0_54, %c0_55, %c0_56] : memref<2x1x32xf32, #tpu.memory_space<vmem>>, vector<1x1x32xf32>
    %118 = vector.shape_cast %117 : vector<1x1x32xf32> to vector<1x32xf32>
    %119 = arith.truncf %114 : vector<2x32xf32> to vector<2x32xbf16>
    %cst_57 = arith.constant dense<0.000000e+00> : vector<2x32xf32>
    %120 = tpu.matmul %119, %116, %cst_57 {dimension_numbers = #tpu.dot_dimension_numbers<[1], [0], [0], [1], [0, 0, 1, 1], [], []>} : vector<2x32xbf16>, vector<32x32xbf16>, vector<2x32xf32> -> vector<2x32xf32>
    %121 = vector.broadcast %118 : vector<1x32xf32> to vector<2x32xf32>
    %122 = arith.addf %120, %121 : vector<2x32xf32>
    %123 = arith.addf %122, %73 : vector<2x32xf32>
    %c0_58 = arith.constant 0 : index
    %c0_59 = arith.constant 0 : index
    %c0_60 = arith.constant 0 : index
    %124 = vector.load %arg16[%c0_58, %c0_59, %c0_60] : memref<2x1x32xf32, #tpu.memory_space<vmem>>, vector<1x1x32xf32>
    %125 = vector.shape_cast %124 : vector<1x1x32xf32> to vector<1x32xf32>
    %c0_61 = arith.constant 0 : index
    %c0_62 = arith.constant 0 : index
    %c0_63 = arith.constant 0 : index
    %126 = vector.load %arg17[%c0_61, %c0_62, %c0_63] : memref<2x1x32xf32, #tpu.memory_space<vmem>>, vector<1x1x32xf32>
    %127 = vector.shape_cast %126 : vector<1x1x32xf32> to vector<1x32xf32>
    %cst_64 = arith.constant dense<0.000000e+00> : vector<2xf32>
    %128 = vector.multi_reduction <add>, %123, %cst_64 [1] : vector<2x32xf32> to vector<2xf32>
    %129 = vector.shape_cast %128 : vector<2xf32> to vector<2x1xf32>
    %cst_65 = arith.constant 3.200000e+01 : f32
    %130 = vector.broadcast %cst_65 : f32 to vector<2x1xf32>
    %131 = arith.divf %129, %130 : vector<2x1xf32>
    %132 = vector.broadcast %131 : vector<2x1xf32> to vector<2x32xf32>
    %133 = arith.subf %123, %132 : vector<2x32xf32>
    %134 = arith.mulf %133, %133 : vector<2x32xf32>
    %cst_66 = arith.constant dense<0.000000e+00> : vector<2xf32>
    %135 = vector.multi_reduction <add>, %134, %cst_66 [1] : vector<2x32xf32> to vector<2xf32>
    %136 = vector.shape_cast %135 : vector<2xf32> to vector<2x1xf32>
    %cst_67 = arith.constant 3.200000e+01 : f32
    %137 = vector.broadcast %cst_67 : f32 to vector<2x1xf32>
    %138 = arith.divf %136, %137 : vector<2x1xf32>
    %139 = vector.broadcast %131 : vector<2x1xf32> to vector<2x32xf32>
    %140 = arith.subf %123, %139 : vector<2x32xf32>
    %cst_68 = arith.constant 9.99999974E-6 : f32
    %141 = vector.broadcast %cst_68 : f32 to vector<2x1xf32>
    %142 = arith.addf %138, %141 : vector<2x1xf32>
    %143 = math.rsqrt %142 : vector<2x1xf32>
    %144 = vector.broadcast %143 : vector<2x1xf32> to vector<2x32xf32>
    %145 = arith.mulf %140, %144 : vector<2x32xf32>
    %146 = vector.broadcast %125 : vector<1x32xf32> to vector<2x32xf32>
    %147 = arith.mulf %145, %146 : vector<2x32xf32>
    %148 = vector.broadcast %127 : vector<1x32xf32> to vector<2x32xf32>
    %149 = arith.addf %147, %148 : vector<2x32xf32>
    %c0_69 = arith.constant 0 : index
    %c0_70 = arith.constant 0 : index
    %c0_71 = arith.constant 0 : index
    %150 = vector.load %arg18[%c0_69, %c0_70, %c0_71] : memref<2x32x128xbf16, #tpu.memory_space<vmem>>, vector<1x32x128xbf16>
    %151 = vector.shape_cast %150 : vector<1x32x128xbf16> to vector<32x128xbf16>
    %c0_72 = arith.constant 0 : index
    %c0_73 = arith.constant 0 : index
    %c0_74 = arith.constant 0 : index
    %152 = vector.load %arg19[%c0_72, %c0_73, %c0_74] : memref<2x1x128xf32, #tpu.memory_space<vmem>>, vector<1x1x128xf32>
    %153 = vector.shape_cast %152 : vector<1x1x128xf32> to vector<1x128xf32>
    %154 = arith.truncf %149 : vector<2x32xf32> to vector<2x32xbf16>
    %cst_75 = arith.constant dense<0.000000e+00> : vector<2x128xf32>
    %155 = tpu.matmul %154, %151, %cst_75 {dimension_numbers = #tpu.dot_dimension_numbers<[1], [0], [0], [1], [0, 0, 1, 1], [], []>} : vector<2x32xbf16>, vector<32x128xbf16>, vector<2x128xf32> -> vector<2x128xf32>
    %156 = vector.broadcast %153 : vector<1x128xf32> to vector<2x128xf32>
    %157 = arith.addf %155, %156 : vector<2x128xf32>
    %cst_76 = arith.constant 0.000000e+00 : f32
    %158 = vector.broadcast %cst_76 : f32 to vector<2x128xf32>
    %159 = arith.maximumf %157, %158 : vector<2x128xf32>
    %c0_77 = arith.constant 0 : index
    %c0_78 = arith.constant 0 : index
    %c0_79 = arith.constant 0 : index
    %160 = vector.load %arg20[%c0_77, %c0_78, %c0_79] : memref<2x128x32xbf16, #tpu.memory_space<vmem>>, vector<1x128x32xbf16>
    %161 = vector.shape_cast %160 : vector<1x128x32xbf16> to vector<128x32xbf16>
    %c0_80 = arith.constant 0 : index
    %c0_81 = arith.constant 0 : index
    %c0_82 = arith.constant 0 : index
    %162 = vector.load %arg21[%c0_80, %c0_81, %c0_82] : memref<2x1x32xf32, #tpu.memory_space<vmem>>, vector<1x1x32xf32>
    %163 = vector.shape_cast %162 : vector<1x1x32xf32> to vector<1x32xf32>
    %164 = arith.truncf %159 : vector<2x128xf32> to vector<2x128xbf16>
    %cst_83 = arith.constant dense<0.000000e+00> : vector<2x32xf32>
    %165 = tpu.matmul %164, %161, %cst_83 {dimension_numbers = #tpu.dot_dimension_numbers<[1], [0], [0], [1], [0, 0, 1, 1], [], []>} : vector<2x128xbf16>, vector<128x32xbf16>, vector<2x32xf32> -> vector<2x32xf32>
    %166 = vector.broadcast %163 : vector<1x32xf32> to vector<2x32xf32>
    %167 = arith.addf %165, %166 : vector<2x32xf32>
    %168 = arith.addf %167, %149 : vector<2x32xf32>
    %c0_84 = arith.constant 0 : index
    %c0_85 = arith.constant 0 : index
    %c0_86 = arith.constant 0 : index
    %169 = vector.load %arg22[%c0_84, %c0_85, %c0_86] : memref<2x1x32xf32, #tpu.memory_space<vmem>>, vector<1x1x32xf32>
    %170 = vector.shape_cast %169 : vector<1x1x32xf32> to vector<1x32xf32>
    %c0_87 = arith.constant 0 : index
    %c0_88 = arith.constant 0 : index
    %c0_89 = arith.constant 0 : index
    %171 = vector.load %arg23[%c0_87, %c0_88, %c0_89] : memref<2x1x32xf32, #tpu.memory_space<vmem>>, vector<1x1x32xf32>
    %172 = vector.shape_cast %171 : vector<1x1x32xf32> to vector<1x32xf32>
    %cst_90 = arith.constant dense<0.000000e+00> : vector<2xf32>
    %173 = vector.multi_reduction <add>, %168, %cst_90 [1] : vector<2x32xf32> to vector<2xf32>
    %174 = vector.shape_cast %173 : vector<2xf32> to vector<2x1xf32>
    %cst_91 = arith.constant 3.200000e+01 : f32
    %175 = vector.broadcast %cst_91 : f32 to vector<2x1xf32>
    %176 = arith.divf %174, %175 : vector<2x1xf32>
    %177 = vector.broadcast %176 : vector<2x1xf32> to vector<2x32xf32>
    %178 = arith.subf %168, %177 : vector<2x32xf32>
    %179 = arith.mulf %178, %178 : vector<2x32xf32>
    %cst_92 = arith.constant dense<0.000000e+00> : vector<2xf32>
    %180 = vector.multi_reduction <add>, %179, %cst_92 [1] : vector<2x32xf32> to vector<2xf32>
    %181 = vector.shape_cast %180 : vector<2xf32> to vector<2x1xf32>
    %cst_93 = arith.constant 3.200000e+01 : f32
    %182 = vector.broadcast %cst_93 : f32 to vector<2x1xf32>
    %183 = arith.divf %181, %182 : vector<2x1xf32>
    %184 = vector.broadcast %176 : vector<2x1xf32> to vector<2x32xf32>
    %185 = arith.subf %168, %184 : vector<2x32xf32>
    %cst_94 = arith.constant 9.99999974E-6 : f32
    %186 = vector.broadcast %cst_94 : f32 to vector<2x1xf32>
    %187 = arith.addf %183, %186 : vector<2x1xf32>
    %188 = math.rsqrt %187 : vector<2x1xf32>
    %189 = vector.broadcast %188 : vector<2x1xf32> to vector<2x32xf32>
    %190 = arith.mulf %185, %189 : vector<2x32xf32>
    %191 = vector.broadcast %170 : vector<1x32xf32> to vector<2x32xf32>
    %192 = arith.mulf %190, %191 : vector<2x32xf32>
    %193 = vector.broadcast %172 : vector<1x32xf32> to vector<2x32xf32>
    %194 = arith.addf %192, %193 : vector<2x32xf32>
    %c0_95 = arith.constant 0 : index
    %c0_96 = arith.constant 0 : index
    %195 = vector.load %arg4[%c0_95, %c0_96] : memref<32x96xbf16, #tpu.memory_space<vmem>>, vector<32x96xbf16>
    %c0_97 = arith.constant 0 : index
    %c0_98 = arith.constant 0 : index
    %196 = vector.load %arg5[%c0_97, %c0_98] : memref<1x96xf32, #tpu.memory_space<vmem>>, vector<1x96xf32>
    %197 = arith.truncf %194 : vector<2x32xf32> to vector<2x32xbf16>
    %cst_99 = arith.constant dense<0.000000e+00> : vector<2x96xf32>
    %198 = tpu.matmul %197, %195, %cst_99 {dimension_numbers = #tpu.dot_dimension_numbers<[1], [0], [0], [1], [0, 0, 1, 1], [], []>} : vector<2x32xbf16>, vector<32x96xbf16>, vector<2x96xf32> -> vector<2x96xf32>
    %199 = vector.broadcast %196 : vector<1x96xf32> to vector<2x96xf32>
    %200 = arith.addf %198, %199 : vector<2x96xf32>
    %201 = vector.extract_strided_slice %200 {offsets = [0, 64], sizes = [2, 32], strides = [1, 1]} : vector<2x96xf32> to vector<2x32xf32>
    %c0_100 = arith.constant 0 : index
    %c0_101 = arith.constant 0 : index
    %202 = vector.load %arg6[%c0_100, %c0_101] : memref<32x32xbf16, #tpu.memory_space<vmem>>, vector<32x32xbf16>
    %c0_102 = arith.constant 0 : index
    %c0_103 = arith.constant 0 : index
    %203 = vector.load %arg7[%c0_102, %c0_103] : memref<1x32xf32, #tpu.memory_space<vmem>>, vector<1x32xf32>
    %204 = arith.truncf %201 : vector<2x32xf32> to vector<2x32xbf16>
    %cst_104 = arith.constant dense<0.000000e+00> : vector<2x32xf32>
    %205 = tpu.matmul %204, %202, %cst_104 {dimension_numbers = #tpu.dot_dimension_numbers<[1], [0], [0], [1], [0, 0, 1, 1], [], []>} : vector<2x32xbf16>, vector<32x32xbf16>, vector<2x32xf32> -> vector<2x32xf32>
    %206 = vector.broadcast %203 : vector<1x32xf32> to vector<2x32xf32>
    %207 = arith.addf %205, %206 : vector<2x32xf32>
    %208 = arith.addf %207, %194 : vector<2x32xf32>
    %c0_105 = arith.constant 0 : index
    %c0_106 = arith.constant 0 : index
    %209 = vector.load %arg8[%c0_105, %c0_106] : memref<1x32xf32, #tpu.memory_space<vmem>>, vector<1x32xf32>
    %c0_107 = arith.constant 0 : index
    %c0_108 = arith.constant 0 : index
    %210 = vector.load %arg9[%c0_107, %c0_108] : memref<1x32xf32, #tpu.memory_space<vmem>>, vector<1x32xf32>
    %cst_109 = arith.constant dense<0.000000e+00> : vector<2xf32>
    %211 = vector.multi_reduction <add>, %208, %cst_109 [1] : vector<2x32xf32> to vector<2xf32>
    %212 = vector.shape_cast %211 : vector<2xf32> to vector<2x1xf32>
    %cst_110 = arith.constant 3.200000e+01 : f32
    %213 = vector.broadcast %cst_110 : f32 to vector<2x1xf32>
    %214 = arith.divf %212, %213 : vector<2x1xf32>
    %215 = vector.broadcast %214 : vector<2x1xf32> to vector<2x32xf32>
    %216 = arith.subf %208, %215 : vector<2x32xf32>
    %217 = arith.mulf %216, %216 : vector<2x32xf32>
    %cst_111 = arith.constant dense<0.000000e+00> : vector<2xf32>
    %218 = vector.multi_reduction <add>, %217, %cst_111 [1] : vector<2x32xf32> to vector<2xf32>
    %219 = vector.shape_cast %218 : vector<2xf32> to vector<2x1xf32>
    %cst_112 = arith.constant 3.200000e+01 : f32
    %220 = vector.broadcast %cst_112 : f32 to vector<2x1xf32>
    %221 = arith.divf %219, %220 : vector<2x1xf32>
    %222 = vector.broadcast %214 : vector<2x1xf32> to vector<2x32xf32>
    %223 = arith.subf %208, %222 : vector<2x32xf32>
    %cst_113 = arith.constant 9.99999974E-6 : f32
    %224 = vector.broadcast %cst_113 : f32 to vector<2x1xf32>
    %225 = arith.addf %221, %224 : vector<2x1xf32>
    %226 = math.rsqrt %225 : vector<2x1xf32>
    %227 = vector.broadcast %226 : vector<2x1xf32> to vector<2x32xf32>
    %228 = arith.mulf %223, %227 : vector<2x32xf32>
    %229 = vector.broadcast %209 : vector<1x32xf32> to vector<2x32xf32>
    %230 = arith.mulf %228, %229 : vector<2x32xf32>
    %231 = vector.broadcast %210 : vector<1x32xf32> to vector<2x32xf32>
    %232 = arith.addf %230, %231 : vector<2x32xf32>
    %c1 = arith.constant 1 : index
    %c0_114 = arith.constant 0 : index
    %c0_115 = arith.constant 0 : index
    %233 = vector.load %arg10[%c1, %c0_114, %c0_115] : memref<2x32x32xbf16, #tpu.memory_space<vmem>>, vector<1x32x32xbf16>
    %234 = vector.shape_cast %233 : vector<1x32x32xbf16> to vector<32x32xbf16>
    %c1_116 = arith.constant 1 : index
    %c0_117 = arith.constant 0 : index
    %c0_118 = arith.constant 0 : index
    %235 = vector.load %arg11[%c1_116, %c0_117, %c0_118] : memref<2x1x32xf32, #tpu.memory_space<vmem>>, vector<1x1x32xf32>
    %236 = vector.shape_cast %235 : vector<1x1x32xf32> to vector<1x32xf32>
    %237 = arith.truncf %232 : vector<2x32xf32> to vector<2x32xbf16>
    %cst_119 = arith.constant dense<0.000000e+00> : vector<2x32xf32>
    %238 = tpu.matmul %237, %234, %cst_119 {dimension_numbers = #tpu.dot_dimension_numbers<[1], [0], [0], [1], [0, 0, 1, 1], [], []>} : vector<2x32xbf16>, vector<32x32xbf16>, vector<2x32xf32> -> vector<2x32xf32>
    %239 = vector.broadcast %236 : vector<1x32xf32> to vector<2x32xf32>
    %240 = arith.addf %238, %239 : vector<2x32xf32>
    %c1_120 = arith.constant 1 : index
    %c0_121 = arith.constant 0 : index
    %c0_122 = arith.constant 0 : index
    %241 = vector.load %arg12[%c1_120, %c0_121, %c0_122] : memref<2x32x64xbf16, #tpu.memory_space<vmem>>, vector<1x32x64xbf16>
    %242 = vector.shape_cast %241 : vector<1x32x64xbf16> to vector<32x64xbf16>
    %c1_123 = arith.constant 1 : index
    %c0_124 = arith.constant 0 : index
    %c0_125 = arith.constant 0 : index
    %243 = vector.load %arg13[%c1_123, %c0_124, %c0_125] : memref<2x1x64xf32, #tpu.memory_space<vmem>>, vector<1x1x64xf32>
    %244 = vector.shape_cast %243 : vector<1x1x64xf32> to vector<1x64xf32>
    %cst_126 = arith.constant dense<0.000000e+00> : vector<16x64xf32>
    %245 = tpu.matmul %5, %242, %cst_126 {dimension_numbers = #tpu.dot_dimension_numbers<[1], [0], [0], [1], [0, 0, 1, 1], [], []>} : vector<16x32xbf16>, vector<32x64xbf16>, vector<16x64xf32> -> vector<16x64xf32>
    %246 = vector.broadcast %244 : vector<1x64xf32> to vector<16x64xf32>
    %247 = arith.addf %245, %246 : vector<16x64xf32>
    %248 = vector.shape_cast %247 : vector<16x64xf32> to vector<2x8x64xf32>
    %249 = vector.extract_strided_slice %248 {offsets = [0, 0, 0], sizes = [2, 8, 32], strides = [1, 1, 1]} : vector<2x8x64xf32> to vector<2x8x32xf32>
    %250 = vector.extract_strided_slice %248 {offsets = [0, 0, 32], sizes = [2, 8, 32], strides = [1, 1, 1]} : vector<2x8x64xf32> to vector<2x8x32xf32>
    %251 = vector.shape_cast %240 : vector<2x32xf32> to vector<2x1x32xf32>
    %252 = vector.broadcast %251 : vector<2x1x32xf32> to vector<2x8x32xf32>
    %253 = arith.mulf %252, %249 : vector<2x8x32xf32>
    %254 = arith.truncf %253 : vector<2x8x32xf32> to vector<2x8x32xbf16>
    %255 = vector.shape_cast %254 : vector<2x8x32xbf16> to vector<16x32xbf16>
    %cst_127 = arith.constant dense<0.000000e+00> : vector<16x4xf32>
    %256 = tpu.matmul %255, %0, %cst_127 {dimension_numbers = #tpu.dot_dimension_numbers<[1], [0], [0], [1], [0, 0, 1, 1], [], []>} : vector<16x32xbf16>, vector<32x4xbf16>, vector<16x4xf32> -> vector<16x4xf32>
    %257 = vector.shape_cast %256 : vector<16x4xf32> to vector<2x8x4xf32>
    %cst_128 = arith.constant dense<0xFF800000> : vector<2x4xf32>
    %258 = vector.multi_reduction <maximumf>, %257, %cst_128 [1] : vector<2x8x4xf32> to vector<2x4xf32>
    %259 = vector.shape_cast %258 : vector<2x4xf32> to vector<2x1x4xf32>
    %260 = vector.broadcast %259 : vector<2x1x4xf32> to vector<2x8x4xf32>
    %261 = arith.subf %257, %260 : vector<2x8x4xf32>
    %262 = math.exp %261 : vector<2x8x4xf32>
    %cst_129 = arith.constant dense<0.000000e+00> : vector<2x4xf32>
    %263 = vector.multi_reduction <add>, %262, %cst_129 [1] : vector<2x8x4xf32> to vector<2x4xf32>
    %264 = vector.shape_cast %263 : vector<2x4xf32> to vector<2x1x4xf32>
    %265 = tpu.reciprocal %264 {approx = true} : vector<2x1x4xf32> -> vector<2x1x4xf32>
    %266 = vector.broadcast %265 : vector<2x1x4xf32> to vector<2x8x4xf32>
    %267 = arith.mulf %262, %266 : vector<2x8x4xf32>
    %268 = vector.shape_cast %267 : vector<2x8x4xf32> to vector<16x4xf32>
    %269 = arith.truncf %268 : vector<16x4xf32> to vector<16x4xbf16>
    %cst_130 = arith.constant dense<0.000000e+00> : vector<16x32xf32>
    %270 = tpu.matmul %269, %1, %cst_130 {dimension_numbers = #tpu.dot_dimension_numbers<[1], [0], [0], [1], [0, 0, 1, 1], [], []>} : vector<16x4xbf16>, vector<4x32xbf16>, vector<16x32xf32> -> vector<16x32xf32>
    %271 = vector.shape_cast %270 : vector<16x32xf32> to vector<2x8x32xf32>
    %272 = arith.mulf %271, %250 : vector<2x8x32xf32>
    %cst_131 = arith.constant dense<0.000000e+00> : vector<2x32xf32>
    %273 = vector.multi_reduction <add>, %272, %cst_131 [1] : vector<2x8x32xf32> to vector<2x32xf32>
    %c1_132 = arith.constant 1 : index
    %c0_133 = arith.constant 0 : index
    %c0_134 = arith.constant 0 : index
    %274 = vector.load %arg14[%c1_132, %c0_133, %c0_134] : memref<2x32x32xbf16, #tpu.memory_space<vmem>>, vector<1x32x32xbf16>
    %275 = vector.shape_cast %274 : vector<1x32x32xbf16> to vector<32x32xbf16>
    %c1_135 = arith.constant 1 : index
    %c0_136 = arith.constant 0 : index
    %c0_137 = arith.constant 0 : index
    %276 = vector.load %arg15[%c1_135, %c0_136, %c0_137] : memref<2x1x32xf32, #tpu.memory_space<vmem>>, vector<1x1x32xf32>
    %277 = vector.shape_cast %276 : vector<1x1x32xf32> to vector<1x32xf32>
    %278 = arith.truncf %273 : vector<2x32xf32> to vector<2x32xbf16>
    %cst_138 = arith.constant dense<0.000000e+00> : vector<2x32xf32>
    %279 = tpu.matmul %278, %275, %cst_138 {dimension_numbers = #tpu.dot_dimension_numbers<[1], [0], [0], [1], [0, 0, 1, 1], [], []>} : vector<2x32xbf16>, vector<32x32xbf16>, vector<2x32xf32> -> vector<2x32xf32>
    %280 = vector.broadcast %277 : vector<1x32xf32> to vector<2x32xf32>
    %281 = arith.addf %279, %280 : vector<2x32xf32>
    %282 = arith.addf %281, %232 : vector<2x32xf32>
    %c1_139 = arith.constant 1 : index
    %c0_140 = arith.constant 0 : index
    %c0_141 = arith.constant 0 : index
    %283 = vector.load %arg16[%c1_139, %c0_140, %c0_141] : memref<2x1x32xf32, #tpu.memory_space<vmem>>, vector<1x1x32xf32>
    %284 = vector.shape_cast %283 : vector<1x1x32xf32> to vector<1x32xf32>
    %c1_142 = arith.constant 1 : index
    %c0_143 = arith.constant 0 : index
    %c0_144 = arith.constant 0 : index
    %285 = vector.load %arg17[%c1_142, %c0_143, %c0_144] : memref<2x1x32xf32, #tpu.memory_space<vmem>>, vector<1x1x32xf32>
    %286 = vector.shape_cast %285 : vector<1x1x32xf32> to vector<1x32xf32>
    %cst_145 = arith.constant dense<0.000000e+00> : vector<2xf32>
    %287 = vector.multi_reduction <add>, %282, %cst_145 [1] : vector<2x32xf32> to vector<2xf32>
    %288 = vector.shape_cast %287 : vector<2xf32> to vector<2x1xf32>
    %cst_146 = arith.constant 3.200000e+01 : f32
    %289 = vector.broadcast %cst_146 : f32 to vector<2x1xf32>
    %290 = arith.divf %288, %289 : vector<2x1xf32>
    %291 = vector.broadcast %290 : vector<2x1xf32> to vector<2x32xf32>
    %292 = arith.subf %282, %291 : vector<2x32xf32>
    %293 = arith.mulf %292, %292 : vector<2x32xf32>
    %cst_147 = arith.constant dense<0.000000e+00> : vector<2xf32>
    %294 = vector.multi_reduction <add>, %293, %cst_147 [1] : vector<2x32xf32> to vector<2xf32>
    %295 = vector.shape_cast %294 : vector<2xf32> to vector<2x1xf32>
    %cst_148 = arith.constant 3.200000e+01 : f32
    %296 = vector.broadcast %cst_148 : f32 to vector<2x1xf32>
    %297 = arith.divf %295, %296 : vector<2x1xf32>
    %298 = vector.broadcast %290 : vector<2x1xf32> to vector<2x32xf32>
    %299 = arith.subf %282, %298 : vector<2x32xf32>
    %cst_149 = arith.constant 9.99999974E-6 : f32
    %300 = vector.broadcast %cst_149 : f32 to vector<2x1xf32>
    %301 = arith.addf %297, %300 : vector<2x1xf32>
    %302 = math.rsqrt %301 : vector<2x1xf32>
    %303 = vector.broadcast %302 : vector<2x1xf32> to vector<2x32xf32>
    %304 = arith.mulf %299, %303 : vector<2x32xf32>
    %305 = vector.broadcast %284 : vector<1x32xf32> to vector<2x32xf32>
    %306 = arith.mulf %304, %305 : vector<2x32xf32>
    %307 = vector.broadcast %286 : vector<1x32xf32> to vector<2x32xf32>
    %308 = arith.addf %306, %307 : vector<2x32xf32>
    %c1_150 = arith.constant 1 : index
    %c0_151 = arith.constant 0 : index
    %c0_152 = arith.constant 0 : index
    %309 = vector.load %arg18[%c1_150, %c0_151, %c0_152] : memref<2x32x128xbf16, #tpu.memory_space<vmem>>, vector<1x32x128xbf16>
    %310 = vector.shape_cast %309 : vector<1x32x128xbf16> to vector<32x128xbf16>
    %c1_153 = arith.constant 1 : index
    %c0_154 = arith.constant 0 : index
    %c0_155 = arith.constant 0 : index
    %311 = vector.load %arg19[%c1_153, %c0_154, %c0_155] : memref<2x1x128xf32, #tpu.memory_space<vmem>>, vector<1x1x128xf32>
    %312 = vector.shape_cast %311 : vector<1x1x128xf32> to vector<1x128xf32>
    %313 = arith.truncf %308 : vector<2x32xf32> to vector<2x32xbf16>
    %cst_156 = arith.constant dense<0.000000e+00> : vector<2x128xf32>
    %314 = tpu.matmul %313, %310, %cst_156 {dimension_numbers = #tpu.dot_dimension_numbers<[1], [0], [0], [1], [0, 0, 1, 1], [], []>} : vector<2x32xbf16>, vector<32x128xbf16>, vector<2x128xf32> -> vector<2x128xf32>
    %315 = vector.broadcast %312 : vector<1x128xf32> to vector<2x128xf32>
    %316 = arith.addf %314, %315 : vector<2x128xf32>
    %cst_157 = arith.constant 0.000000e+00 : f32
    %317 = vector.broadcast %cst_157 : f32 to vector<2x128xf32>
    %318 = arith.maximumf %316, %317 : vector<2x128xf32>
    %c1_158 = arith.constant 1 : index
    %c0_159 = arith.constant 0 : index
    %c0_160 = arith.constant 0 : index
    %319 = vector.load %arg20[%c1_158, %c0_159, %c0_160] : memref<2x128x32xbf16, #tpu.memory_space<vmem>>, vector<1x128x32xbf16>
    %320 = vector.shape_cast %319 : vector<1x128x32xbf16> to vector<128x32xbf16>
    %c1_161 = arith.constant 1 : index
    %c0_162 = arith.constant 0 : index
    %c0_163 = arith.constant 0 : index
    %321 = vector.load %arg21[%c1_161, %c0_162, %c0_163] : memref<2x1x32xf32, #tpu.memory_space<vmem>>, vector<1x1x32xf32>
    %322 = vector.shape_cast %321 : vector<1x1x32xf32> to vector<1x32xf32>
    %323 = arith.truncf %318 : vector<2x128xf32> to vector<2x128xbf16>
    %cst_164 = arith.constant dense<0.000000e+00> : vector<2x32xf32>
    %324 = tpu.matmul %323, %320, %cst_164 {dimension_numbers = #tpu.dot_dimension_numbers<[1], [0], [0], [1], [0, 0, 1, 1], [], []>} : vector<2x128xbf16>, vector<128x32xbf16>, vector<2x32xf32> -> vector<2x32xf32>
    %325 = vector.broadcast %322 : vector<1x32xf32> to vector<2x32xf32>
    %326 = arith.addf %324, %325 : vector<2x32xf32>
    %327 = arith.addf %326, %308 : vector<2x32xf32>
    %c1_165 = arith.constant 1 : index
    %c0_166 = arith.constant 0 : index
    %c0_167 = arith.constant 0 : index
    %328 = vector.load %arg22[%c1_165, %c0_166, %c0_167] : memref<2x1x32xf32, #tpu.memory_space<vmem>>, vector<1x1x32xf32>
    %329 = vector.shape_cast %328 : vector<1x1x32xf32> to vector<1x32xf32>
    %c1_168 = arith.constant 1 : index
    %c0_169 = arith.constant 0 : index
    %c0_170 = arith.constant 0 : index
    %330 = vector.load %arg23[%c1_168, %c0_169, %c0_170] : memref<2x1x32xf32, #tpu.memory_space<vmem>>, vector<1x1x32xf32>
    %331 = vector.shape_cast %330 : vector<1x1x32xf32> to vector<1x32xf32>
    %cst_171 = arith.constant dense<0.000000e+00> : vector<2xf32>
    %332 = vector.multi_reduction <add>, %327, %cst_171 [1] : vector<2x32xf32> to vector<2xf32>
    %333 = vector.shape_cast %332 : vector<2xf32> to vector<2x1xf32>
    %cst_172 = arith.constant 3.200000e+01 : f32
    %334 = vector.broadcast %cst_172 : f32 to vector<2x1xf32>
    %335 = arith.divf %333, %334 : vector<2x1xf32>
    %336 = vector.broadcast %335 : vector<2x1xf32> to vector<2x32xf32>
    %337 = arith.subf %327, %336 : vector<2x32xf32>
    %338 = arith.mulf %337, %337 : vector<2x32xf32>
    %cst_173 = arith.constant dense<0.000000e+00> : vector<2xf32>
    %339 = vector.multi_reduction <add>, %338, %cst_173 [1] : vector<2x32xf32> to vector<2xf32>
    %340 = vector.shape_cast %339 : vector<2xf32> to vector<2x1xf32>
    %cst_174 = arith.constant 3.200000e+01 : f32
    %341 = vector.broadcast %cst_174 : f32 to vector<2x1xf32>
    %342 = arith.divf %340, %341 : vector<2x1xf32>
    %343 = vector.broadcast %335 : vector<2x1xf32> to vector<2x32xf32>
    %344 = arith.subf %327, %343 : vector<2x32xf32>
    %cst_175 = arith.constant 9.99999974E-6 : f32
    %345 = vector.broadcast %cst_175 : f32 to vector<2x1xf32>
    %346 = arith.addf %342, %345 : vector<2x1xf32>
    %347 = math.rsqrt %346 : vector<2x1xf32>
    %348 = vector.broadcast %347 : vector<2x1xf32> to vector<2x32xf32>
    %349 = arith.mulf %344, %348 : vector<2x32xf32>
    %350 = vector.broadcast %329 : vector<1x32xf32> to vector<2x32xf32>
    %351 = arith.mulf %349, %350 : vector<2x32xf32>
    %352 = vector.broadcast %331 : vector<1x32xf32> to vector<2x32xf32>
    %353 = arith.addf %351, %352 : vector<2x32xf32>
    %c0_176 = arith.constant 0 : index
    %c0_177 = arith.constant 0 : index
    %354 = vector.load %arg24[%c0_176, %c0_177] : memref<32x128xbf16, #tpu.memory_space<vmem>>, vector<32x128xbf16>
    %c0_178 = arith.constant 0 : index
    %c0_179 = arith.constant 0 : index
    %355 = vector.load %arg25[%c0_178, %c0_179] : memref<1x128xf32, #tpu.memory_space<vmem>>, vector<1x128xf32>
    %356 = arith.truncf %353 : vector<2x32xf32> to vector<2x32xbf16>
    %cst_180 = arith.constant dense<0.000000e+00> : vector<2x128xf32>
    %357 = tpu.matmul %356, %354, %cst_180 {dimension_numbers = #tpu.dot_dimension_numbers<[1], [0], [0], [1], [0, 0, 1, 1], [], []>} : vector<2x32xbf16>, vector<32x128xbf16>, vector<2x128xf32> -> vector<2x128xf32>
    %358 = vector.broadcast %355 : vector<1x128xf32> to vector<2x128xf32>
    %359 = arith.addf %357, %358 : vector<2x128xf32>
    %cst_181 = arith.constant dense<0xFF800000> : vector<2xf32>
    %360 = vector.multi_reduction <maximumf>, %359, %cst_181 [1] : vector<2x128xf32> to vector<2xf32>
    %361 = vector.shape_cast %360 : vector<2xf32> to vector<2x1xf32>
    %362 = vector.broadcast %361 : vector<2x1xf32> to vector<2x128xf32>
    %363 = arith.subf %359, %362 : vector<2x128xf32>
    %364 = math.exp %363 : vector<2x128xf32>
    %cst_182 = arith.constant dense<0.000000e+00> : vector<2xf32>
    %365 = vector.multi_reduction <add>, %364, %cst_182 [1] : vector<2x128xf32> to vector<2xf32>
    %366 = vector.shape_cast %365 : vector<2xf32> to vector<2x1xf32>
    %367 = math.log %366 : vector<2x1xf32>
    %368 = vector.broadcast %367 : vector<2x1xf32> to vector<2x128xf32>
    %369 = arith.subf %363, %368 : vector<2x128xf32>
    %c0_183 = arith.constant 0 : index
    %c0_184 = arith.constant 0 : index
    %370 = vector.load %arg26[%c0_183, %c0_184] : memref<2x128xf32, #tpu.memory_space<vmem>>, vector<2x128xf32>
    tpu.vector_store %arg26[%c0_183, %c0_184], %369 {strides = array<i32>} : memref<2x128xf32, #tpu.memory_space<vmem>>, vector<2x128xf32>,
    return
  }
}

</mosaic_0001>

<bundles_post_ra>
// kernel: decoder_forward.1
= control target key start
LH: loop header
LB: loop body
LE: loop exit
PB: predicated region body
PF: predicated region fallthrough
CT: control target
= control target key end

     0   :  { %s3704_s0 = inlined_call_operand.vmem [shape: f32[2,8,32], index: 0, kind: input, shape index: {}]   ;;  %s3705_s1 = inlined_call_operand.vmem [shape: f32[2,8,32], index: 1, kind: input, shape index: {}]   ;;  %s3706_s2 = inlined_call_operand.vmem [shape: bf16[32,4], index: 2, kind: input, shape index: {}]   ;;  %s3707_s3 = inlined_call_operand.vmem [shape: bf16[4,32], index: 3, kind: input, shape index: {}]   ;;  %s3708_s4 = inlined_call_operand.vmem [shape: bf16[32,96], index: 4, kind: input, shape index: {}]   ;;  %s3709_s5 = inlined_call_operand.hbm [shape: f32[1,96], index: 5, kind: input, shape index: {}]   ;;  %s3710_s6 = inlined_call_operand.vmem [shape: bf16[32,32], index: 6, kind: input, shape index: {}]   ;;  %s3711_s7 = inlined_call_operand.hbm [shape: f32[1,32], index: 7, kind: input, shape index: {}]   ;;  %s3712_s8 = inlined_call_operand.hbm [shape: f32[1,32], index: 8, kind: input, shape index: {}]   ;;  %s3713_s9 = inlined_call_operand.hbm [shape: f32[1,32], index: 9, kind: input, shape index: {}]   ;;  %s3714_s10 = inlined_call_operand.vmem [shape: bf16[2,32,32], index: 10, kind: input, shape index: {}]   ;;  %s3715_s11 = inlined_call_operand.hbm [shape: f32[2,1,32], index: 11, kind: input, shape index: {}]   ;;  %s3716_s12 = inlined_call_operand.vmem [shape: bf16[2,32,64], index: 12, kind: input, shape index: {}]   ;;  %s3717_s13 = inlined_call_operand.hbm [shape: f32[2,1,64], index: 13, kind: input, shape index: {}]   ;;  %s3718_s14 = inlined_call_operand.vmem [shape: bf16[2,32,32], index: 14, kind: input, shape index: {}]   ;;  %s3719_s15 = inlined_call_operand.hbm [shape: f32[2,1,32], index: 15, kind: input, shape index: {}]   ;;  %s3720_s16 = inlined_call_operand.hbm [shape: f32[2,1,32], index: 16, kind: input, shape index: {}]   ;;  %s3721_s17 = inlined_call_operand.hbm [shape: f32[2,1,32], index: 17, kind: input, shape index: {}]   ;;  %s3722_s18 = inlined_call_operand.vmem [shape: bf16[2,32,128], index: 18, kind: input, shape index: {}]   ;;  %s3723_s19 = inlined_call_operand.hbm [shape: f32[2,1,128], index: 19, kind: input, shape index: {}]   ;;  %s3724_s20 = inlined_call_operand.vmem [shape: bf16[2,128,32], index: 20, kind: input, shape index: {}]   ;;  %s3725_s21 = inlined_call_operand.hbm [shape: f32[2,1,32], index: 21, kind: input, shape index: {}]   ;;  %s3726_s22 = inlined_call_operand.hbm [shape: f32[2,1,32], index: 22, kind: input, shape index: {}]   ;;  %s3727_s23 = inlined_call_operand.hbm [shape: f32[2,1,32], index: 23, kind: input, shape index: {}]   ;;  %s3728_s24 = inlined_call_operand.vmem [shape: bf16[32,128], index: 24, kind: input, shape index: {}]   ;;  %s3729_s25 = inlined_call_operand.vmem [shape: f32[1,128], index: 25, kind: input, shape index: {}]   ;;  %s3730_s26 = inlined_call_operand.hbm [shape: f32[2,128], index: 26, kind: output, shape index: {}]  }
   0x1   :  { %3741 = sst [smem:[#allocation32_spill]] %s3704_s0 }
   0x2   :  { %3742 = sst [smem:[#allocation33_spill]] %s3705_s1 }
   0x3   :  { %3743 = sst [smem:[#allocation34_spill]] %s3706_s2 }
   0x4   :  { %3744 = sst [smem:[#allocation35_spill]] %s3707_s3 }
   0x5   :  { %3745 = sst [smem:[#allocation36_spill]] %s3708_s4 }
   0x6   :  { %3746 = sst [smem:[#allocation37_spill]] %s3709_s5 }
   0x7   :  { %3747 = sst [smem:[#allocation38_spill]] %s3710_s6 }
   0x8   :  { %3748 = sst [smem:[#allocation39_spill]] %s3711_s7 }
   0x9   :  { %3749 = sst [smem:[#allocation40_spill]] %s3712_s8 }
   0xa   :  { %3750 = sst [smem:[#allocation41_spill]] %s3713_s9 }
   0xb   :  { %3751 = sst [smem:[#allocation42_spill]] %s3714_s10 }
   0xc   :  { %31 = vsyncpa [#allocation3], 0 }
   0xd   :  { %32 = vsyncpa [#allocation6], 0 }
   0xe   :  { %33 = vsyncpa [#allocation9], 0 }
   0xf   :  { %34 = vsyncpa [#allocation12], 0 }
  0x10   :  { %35 = vsyncpa [#allocation15], 0 }
  0x11   :  { %36 = vsyncpa [#allocation18], 0 }
  0x12   :  { %37 = vsyncpa [#allocation21], 0 }
  0x13   :  { %38 = vsyncpa [#allocation4], 0  ;;  %s2940_s27 = smov [#allocation5]   ;;  %s2941_s7 = smov [#allocation8]  }
  0x14   :  { %s67_s3 = sshll.u32 %s2940_s27, 4  ;;  %s87_s28 = sshll.u32 %s2941_s7, 4  ;;  %s68_s3 = int_to_ptr.vmem [resolvable:$true] %s67_s3  ;;  %s88_s28 = int_to_ptr.vmem [resolvable:$true] %s87_s28 }
  0x15   :  { %s3752_s29 = sld [smem:[#allocation39_spill]] }
  0x1b   :  { %s2616_s0 = scalar_lea.hbm %s3752_s29, 16 }
  0x1c   :  { %p2617_p0 = scmp.ne.s32.totalorder %s3752_s29, %s2616_s0  ;;  %p2620_p1 = scmp.lt.u32.totalorder %s2616_s0, %s3752_s29 }
  0x1e   :  { %p2622_p2 = pnand %p2620_p1, %p2617_p0 }
  0x20   :  { %2625 = shalt.err (!%p2622_p2)
}
  0x21   :  { %s2626_s10 = scalar_lea.vmem %s68_s3, 16  ;;  %s2630_s6 = scalar_lea.vmem %s68_s3, 32 }
  0x22   :  { %p2627_p3 = scmp.ne.s32.totalorder %s68_s3, %s2626_s10  ;;  %p2631_p4 = scmp.lt.s32.totalorder %s68_s3, %s68_s3 }
  0x23   :  { %p2632_p5 = scmp.lt.s32.totalorder %s2630_s6, %s2626_s10 }
  0x25   :  { %p2633_p6 = por %p2632_p5, %p2631_p4 }
  0x27   :  { %p2634_p7 = pnand %p2633_p6, %p2627_p3 }
  0x29   :  { %2637 = shalt.err (!%p2634_p7)
}
  0x2a   :  { %70 = dma.hbm_to_vmem [thread:$0]  %s3752_s29, 16, %s68_s3, [#allocation6]  }
  0x2b   :  { %s3753_s4 = sld [smem:[#allocation41_spill]] }
  0x31   :  { %s2638_s9 = scalar_lea.hbm %s3753_s4, 16 }
  0x32   :  { %p2639_p8 = scmp.ne.s32.totalorder %s3753_s4, %s2638_s9  ;;  %p2642_p9 = scmp.lt.u32.totalorder %s2638_s9, %s3753_s4 }
  0x34   :  { %p2644_p10 = pnand %p2642_p9, %p2639_p8 }
  0x36   :  { %2647 = shalt.err (!%p2644_p10)
}
  0x37   :  { %s2648_s10 = scalar_lea.vmem %s88_s28, 16  ;;  %s2652_s6 = scalar_lea.vmem %s88_s28, 32 }
  0x38   :  { %p2649_p11 = scmp.ne.s32.totalorder %s88_s28, %s2648_s10  ;;  %p2653_p12 = scmp.lt.s32.totalorder %s88_s28, %s88_s28 }
  0x39   :  { %p2654_p13 = scmp.lt.s32.totalorder %s2652_s6, %s2648_s10 }
  0x3b   :  { %p2655_p0 = por %p2654_p13, %p2653_p12 }
  0x3d   :  { %p2656_p1 = pnand %p2655_p0, %p2649_p11 }
  0x3f   :  { %2659 = shalt.err (!%p2656_p1)
}
  0x40   :  { %90 = dma.hbm_to_vmem [thread:$0]  %s3753_s4, 16, %s88_s28, [#allocation9]  }
  0x41   :  { %s2942_s1 = smov [#allocation11]   ;;  %s2943_s7 = smov [#allocation14]  }
  0x42   :  { %s112_s27 = sshll.u32 %s2942_s1, 4  ;;  %s138_s8 = sshll.u32 %s2943_s7, 4  ;;  %s113_s27 = int_to_ptr.vmem [resolvable:$true] %s112_s27  ;;  %s3120_s8 = int_to_ptr.vmem [resolvable:$true] %s138_s8 }
  0x43   :  { %s2660_s0 = scalar_lea.hbm %s3717_s13, 32 }
  0x44   :  { %p2661_p2 = scmp.ne.s32.totalorder %s3717_s13, %s2660_s0  ;;  %p2664_p3 = scmp.lt.u32.totalorder %s2660_s0, %s3717_s13 }
  0x46   :  { %p2666_p4 = pnand %p2664_p3, %p2661_p2 }
  0x48   :  { %2669 = shalt.err (!%p2666_p4)
}
  0x49   :  { %s2670_s28 = scalar_lea.vmem %s113_s27, 32  ;;  %p2675_p6 = scmp.lt.s32.totalorder %s113_s27, %s113_s27 }
  0x4a   :  { %p2671_p5 = scmp.ne.s32.totalorder %s113_s27, %s2670_s28  ;;  %p2676_p7 = scmp.lt.s32.totalorder %s2670_s28, %s2670_s28 }
  0x4c   :  { %p2677_p8 = por %p2676_p7, %p2675_p6 }
  0x4e   :  { %p2678_p9 = pnand %p2677_p8, %p2671_p5 }
  0x50   :  { %2681 = shalt.err (!%p2678_p9)
}
  0x51   :  { %s2944_s4 = smov 16   ;;  %s2945_s3 = smov 1  }
  0x52   :  { %118 = dma.hbm_to_vmem [thread:$0]  %s3717_s13, 32, %s113_s27, [#allocation12], %s2944_s4, %s2944_s4, %s2945_s3  }
  0x53   :  { %s2682_s30 = scalar_lea.hbm %s3720_s16, 32 }
  0x54   :  { %p2683_p10 = scmp.ne.s32.totalorder %s3720_s16, %s2682_s30  ;;  %p2686_p11 = scmp.lt.u32.totalorder %s2682_s30, %s3720_s16 }
  0x56   :  { %p2688_p12 = pnand %p2686_p11, %p2683_p10 }
  0x58   :  { %2691 = shalt.err (!%p2688_p12)
}
  0x59   :  { %s2692_s6 = scalar_lea.vmem %s3120_s8, 32  ;;  %p2697_p0 = scmp.lt.s32.totalorder %s3120_s8, %s3120_s8 }
  0x5a   :  { %p2693_p13 = scmp.ne.s32.totalorder %s3120_s8, %s2692_s6  ;;  %p2698_p1 = scmp.lt.s32.totalorder %s2692_s6, %s2692_s6 }
  0x5c   :  { %p2699_p2 = por %p2698_p1, %p2697_p0 }
  0x5e   :  { %p2700_p3 = pnand %p2699_p2, %p2693_p13 }
  0x60   :  { %2703 = shalt.err (!%p2700_p3)
}
  0x61   :  { %144 = dma.hbm_to_vmem [thread:$0]  %s3720_s16, 32, %s3120_s8, [#allocation15], %s2944_s4, %s2944_s4, %s2945_s3  }
  0x62   :  { %s2946_s28 = smov [#allocation17]   ;;  %s2947_s1 = smov [#allocation20]  }
  0x63   :  { %s164_s29 = sshll.u32 %s2946_s28, 4  ;;  %s190_s7 = sshll.u32 %s2947_s1, 4  ;;  %s165_s29 = int_to_ptr.vmem [resolvable:$true] %s164_s29  ;;  %s3157_s7 = int_to_ptr.vmem [resolvable:$true] %s190_s7 }
  0x64   :  { %s2704_s0 = scalar_lea.hbm %s3723_s19, 32 }
  0x65   :  { %p2705_p4 = scmp.ne.s32.totalorder %s3723_s19, %s2704_s0  ;;  %p2708_p5 = scmp.lt.u32.totalorder %s2704_s0, %s3723_s19 }
  0x67   :  { %p2710_p6 = pnand %p2708_p5, %p2705_p4 }
  0x69   :  { %2713 = shalt.err (!%p2710_p6)
}
  0x6a   :  { %s2714_s16 = scalar_lea.vmem %s165_s29, 32  ;;  %p2719_p8 = scmp.lt.s32.totalorder %s165_s29, %s165_s29 }
  0x6b   :  { %p2715_p7 = scmp.ne.s32.totalorder %s165_s29, %s2714_s16  ;;  %p2720_p9 = scmp.lt.s32.totalorder %s2714_s16, %s2714_s16 }
  0x6d   :  { %p2721_p10 = por %p2720_p9, %p2719_p8 }
  0x6f   :  { %p2722_p11 = pnand %p2721_p10, %p2715_p7 }
  0x71   :  { %2725 = shalt.err (!%p2722_p11)
}
  0x72   :  { %170 = dma.hbm_to_vmem [thread:$0]  %s3723_s19, 32, %s165_s29, [#allocation18], %s2944_s4, %s2944_s4, %s2945_s3  }
  0x73   :  { %s2726_s1 = scalar_lea.hbm %s3726_s22, 32 }
  0x74   :  { %p2727_p12 = scmp.ne.s32.totalorder %s3726_s22, %s2726_s1  ;;  %p2730_p13 = scmp.lt.u32.totalorder %s2726_s1, %s3726_s22 }
  0x76   :  { %p2732_p0 = pnand %p2730_p13, %p2727_p12 }
  0x78   :  { %2735 = shalt.err (!%p2732_p0)
}
  0x79   :  { %s2736_s5 = scalar_lea.vmem %s3157_s7, 32  ;;  %p2741_p2 = scmp.lt.s32.totalorder %s3157_s7, %s3157_s7 }
  0x7a   :  { %p2737_p1 = scmp.ne.s32.totalorder %s3157_s7, %s2736_s5  ;;  %p2742_p3 = scmp.lt.s32.totalorder %s2736_s5, %s2736_s5 }
  0x7c   :  { %p2743_p4 = por %p2742_p3, %p2741_p2 }
  0x7e   :  { %p2744_p5 = pnand %p2743_p4, %p2737_p1 }
  0x80   :  { %2747 = shalt.err (!%p2744_p5)
}
  0x81   :  { %196 = dma.hbm_to_vmem [thread:$0]  %s3726_s22, 32, %s3157_s7, [#allocation21], %s2944_s4, %s2944_s4, %s2945_s3  }
  0x82   :  { %s2948_s10 = smov [#allocation2]   ;;  %s2949_s16 = smov [#allocation7]  }
  0x83   :  { %s55_s6 = sshll.u32 %s2948_s10, 4  ;;  %s77_s8 = sshll.u32 %s2949_s16, 4  ;;  %s56_s6 = int_to_ptr.vmem [resolvable:$true] %s55_s6  ;;  %s78_s8 = int_to_ptr.vmem [resolvable:$true] %s77_s8 }
  0x84   :  { %s3754_s28 = sld [smem:[#allocation37_spill]] }
  0x8a   :  { %s2748_s1 = scalar_lea.hbm %s3754_s28, 16 }
  0x8b   :  { %p2749_p6 = scmp.ne.s32.totalorder %s3754_s28, %s2748_s1  ;;  %p2752_p7 = scmp.lt.u32.totalorder %s2748_s1, %s3754_s28 }
  0x8d   :  { %p2754_p8 = pnand %p2752_p7, %p2749_p6 }
  0x8f   :  { %2757 = shalt.err (!%p2754_p8)
}
  0x90   :  { %s2758_s22 = scalar_lea.vmem %s56_s6, 16  ;;  %s2762_s7 = scalar_lea.vmem %s56_s6, 32 }
  0x91   :  { %p2759_p9 = scmp.ne.s32.totalorder %s56_s6, %s2758_s22  ;;  %p2763_p10 = scmp.lt.s32.totalorder %s56_s6, %s56_s6 }
  0x92   :  { %p2764_p11 = scmp.lt.s32.totalorder %s2762_s7, %s2758_s22 }
  0x94   :  { %p2765_p12 = por %p2764_p11, %p2763_p10 }
  0x96   :  { %p2766_p13 = pnand %p2765_p12, %p2759_p9 }
  0x98   :  { %2769 = shalt.err (!%p2766_p13)
}
  0x99   :  { %58 = dma.hbm_to_vmem [thread:$0]  %s3754_s28, 16, %s56_s6, [#allocation3]  }
  0x9a   :  { %s3755_s16 = sld [smem:[#allocation40_spill]] }
  0xa0   :  { %s2770_s13 = scalar_lea.hbm %s3755_s16, 16 }
  0xa1   :  { %p2771_p0 = scmp.ne.s32.totalorder %s3755_s16, %s2770_s13  ;;  %p2774_p1 = scmp.lt.u32.totalorder %s2770_s13, %s3755_s16 }
  0xa3   :  { %p2776_p2 = pnand %p2774_p1, %p2771_p0 }
  0xa5   :  { %2779 = shalt.err (!%p2776_p2)
}
  0xa6   :  { %s2780_s0 = scalar_lea.vmem %s78_s8, 16  ;;  %s2784_s2 = scalar_lea.vmem %s78_s8, 32 }
  0xa7   :  { %p2781_p3 = scmp.ne.s32.totalorder %s78_s8, %s2780_s0  ;;  %p2785_p4 = scmp.lt.s32.totalorder %s78_s8, %s78_s8 }
  0xa8   :  { %p2786_p5 = scmp.lt.s32.totalorder %s2784_s2, %s2780_s0 }
  0xaa   :  { %p2787_p6 = por %p2786_p5, %p2785_p4 }
  0xac   :  { %p2788_p7 = pnand %p2787_p6, %p2781_p3 }
  0xae   :  { %2791 = shalt.err (!%p2788_p7)
}
  0xaf   :  { %80 = dma.hbm_to_vmem [thread:$0]  %s3755_s16, 16, %s78_s8, [#allocation6]  }
  0xb0   :  { %s2950_s22 = smov [#allocation10]   ;;  %s2951_s5 = smov [#allocation13]  }
  0xb1   :  { %s98_s7 = sshll.u32 %s2950_s22, 4  ;;  %s126_s19 = sshll.u32 %s2951_s5, 4  ;;  %s99_s7 = int_to_ptr.vmem [resolvable:$true] %s98_s7  ;;  %s3218_s19 = int_to_ptr.vmem [resolvable:$true] %s126_s19 }
  0xb2   :  { %s2792_s13 = scalar_lea.hbm %s3715_s11, 32 }
  0xb3   :  { %p2793_p8 = scmp.ne.s32.totalorder %s3715_s11, %s2792_s13  ;;  %p2796_p9 = scmp.lt.u32.totalorder %s2792_s13, %s3715_s11 }
  0xb5   :  { %p2798_p10 = pnand %p2796_p9, %p2793_p8 }
  0xb7   :  { %2801 = shalt.err (!%p2798_p10)
}
  0xb8   :  { %s2802_s8 = scalar_lea.vmem %s99_s7, 32  ;;  %p2807_p12 = scmp.lt.s32.totalorder %s99_s7, %s99_s7 }
  0xb9   :  { %p2803_p11 = scmp.ne.s32.totalorder %s99_s7, %s2802_s8  ;;  %p2808_p13 = scmp.lt.s32.totalorder %s2802_s8, %s2802_s8 }
  0xbb   :  { %p2809_p0 = por %p2808_p13, %p2807_p12 }
  0xbd   :  { %p2810_p1 = pnand %p2809_p0, %p2803_p11 }
  0xbf   :  { %2813 = shalt.err (!%p2810_p1)
}
  0xc0   :  { %104 = dma.hbm_to_vmem [thread:$0]  %s3715_s11, 32, %s99_s7, [#allocation9], %s2944_s4, %s2944_s4, %s2945_s3  }
  0xc1   :  { %s2814_s28 = scalar_lea.hbm %s3719_s15, 32 }
  0xc2   :  { %p2815_p2 = scmp.ne.s32.totalorder %s3719_s15, %s2814_s28  ;;  %p2818_p3 = scmp.lt.u32.totalorder %s2814_s28, %s3719_s15 }
  0xc4   :  { %p2820_p4 = pnand %p2818_p3, %p2815_p2 }
  0xc6   :  { %2823 = shalt.err (!%p2820_p4)
}
  0xc7   :  { %s2824_s13 = scalar_lea.vmem %s3218_s19, 32  ;;  %p2829_p6 = scmp.lt.s32.totalorder %s3218_s19, %s3218_s19 }
  0xc8   :  { %p2825_p5 = scmp.ne.s32.totalorder %s3218_s19, %s2824_s13  ;;  %p2830_p7 = scmp.lt.s32.totalorder %s2824_s13, %s2824_s13 }
  0xca   :  { %p2831_p8 = por %p2830_p7, %p2829_p6 }
  0xcc   :  { %p2832_p9 = pnand %p2831_p8, %p2825_p5 }
  0xce   :  { %2835 = shalt.err (!%p2832_p9)
}
  0xcf   :  { %132 = dma.hbm_to_vmem [thread:$0]  %s3719_s15, 32, %s3218_s19, [#allocation12], %s2944_s4, %s2944_s4, %s2945_s3  }
  0xd0   :  { %s2952_s27 = smov [#allocation16]   ;;  %s2953_s9 = smov [#allocation19]  }
  0xd1   :  { %s150_s1 = sshll.u32 %s2952_s27, 4  ;;  %s178_s30 = sshll.u32 %s2953_s9, 4  ;;  %s151_s1 = int_to_ptr.vmem [resolvable:$true] %s150_s1  ;;  %s3255_s30 = int_to_ptr.vmem [resolvable:$true] %s178_s30 }
  0xd2   :  { %s2836_s0 = scalar_lea.hbm %s3721_s17, 32 }
  0xd3   :  { %p2837_p10 = scmp.ne.s32.totalorder %s3721_s17, %s2836_s0  ;;  %p2840_p11 = scmp.lt.u32.totalorder %s2836_s0, %s3721_s17 }
  0xd5   :  { %p2842_p12 = pnand %p2840_p11, %p2837_p10 }
  0xd7   :  { %2845 = shalt.err (!%p2842_p12)
}
  0xd8   :  { %s2846_s15 = scalar_lea.vmem %s151_s1, 32  ;;  %p2851_p0 = scmp.lt.s32.totalorder %s151_s1, %s151_s1 }
  0xd9   :  { %p2847_p13 = scmp.ne.s32.totalorder %s151_s1, %s2846_s15  ;;  %p2852_p1 = scmp.lt.s32.totalorder %s2846_s15, %s2846_s15 }
  0xdb   :  { %p2853_p2 = por %p2852_p1, %p2851_p0 }
  0xdd   :  { %p2854_p3 = pnand %p2853_p2, %p2847_p13 }
  0xdf   :  { %2857 = shalt.err (!%p2854_p3)
}
  0xe0   :  { %156 = dma.hbm_to_vmem [thread:$0]  %s3721_s17, 32, %s151_s1, [#allocation15], %s2944_s4, %s2944_s4, %s2945_s3  }
  0xe1   :  { %s2858_s13 = scalar_lea.hbm %s3725_s21, 32 }
  0xe2   :  { %p2859_p4 = scmp.ne.s32.totalorder %s3725_s21, %s2858_s13  ;;  %p2862_p5 = scmp.lt.u32.totalorder %s2858_s13, %s3725_s21 }
  0xe4   :  { %p2864_p6 = pnand %p2862_p5, %p2859_p4 }
  0xe6   :  { %2867 = shalt.err (!%p2864_p6)
}
  0xe7   :  { %s2868_s8 = scalar_lea.vmem %s3255_s30, 32  ;;  %p2873_p8 = scmp.lt.s32.totalorder %s3255_s30, %s3255_s30 }
  0xe8   :  { %p2869_p7 = scmp.ne.s32.totalorder %s3255_s30, %s2868_s8  ;;  %p2874_p9 = scmp.lt.s32.totalorder %s2868_s8, %s2868_s8 }
  0xea   :  { %p2875_p10 = por %p2874_p9, %p2873_p8 }
  0xec   :  { %p2876_p11 = pnand %p2875_p10, %p2869_p7 }
  0xee   :  { %2879 = shalt.err (!%p2876_p11)
}
  0xef   :  { %184 = dma.hbm_to_vmem [thread:$0]  %s3725_s21, 32, %s3255_s30, [#allocation18], %s2944_s4, %s2944_s4, %s2945_s3  }
  0xf0   :  { %s2954_s16 = smov [#allocation22]   ;;  %s2880_s28 = scalar_lea.hbm %s3727_s23, 32 }
  0xf1   :  { %s202_s0 = sshll.u32 %s2954_s16, 4  ;;  %p2881_p12 = scmp.ne.s32.totalorder %s3727_s23, %s2880_s28  ;;  %s203_s0 = int_to_ptr.vmem [resolvable:$true] %s202_s0 }
  0xf2   :  { %p2884_p13 = scmp.lt.u32.totalorder %s2880_s28, %s3727_s23 }
  0xf4   :  { %p2886_p0 = pnand %p2884_p13, %p2881_p12 }
  0xf6   :  { %2889 = shalt.err (!%p2886_p0)
}
  0xf7   :  { %s2890_s29 = scalar_lea.vmem %s203_s0, 32  ;;  %p2895_p2 = scmp.lt.s32.totalorder %s203_s0, %s203_s0 }
  0xf8   :  { %p2891_p1 = scmp.ne.s32.totalorder %s203_s0, %s2890_s29  ;;  %p2896_p3 = scmp.lt.s32.totalorder %s2890_s29, %s2890_s29 }
  0xfa   :  { %p2897_p4 = por %p2896_p3, %p2895_p2 }
  0xfc   :  { %p2898_p5 = pnand %p2897_p4, %p2891_p1 }
  0xfe   :  { %2901 = shalt.err (!%p2898_p5)
}
  0xff   :  { %208 = dma.hbm_to_vmem [thread:$0]  %s3727_s23, 32, %s203_s0, [#allocation21], %s2944_s4, %s2944_s4, %s2945_s3  }
 0x100   :  { %2924 = dma.done.wait [#allocation3], 16  }
 0x101   :  { %2925 = vsyncadd [#allocation3], 4294967280 }
 0x102   :  { %2926 = dma.done.wait [#allocation6], 32  }
 0x103   :  { %2927 = vsyncadd [#allocation6], 4294967264 }
 0x104   :  { %2928 = dma.done.wait [#allocation9], 48  }
 0x105   :  { %2929 = vsyncadd [#allocation9], 4294967248 }
 0x106   :  { %2930 = dma.done.wait [#allocation12], 64  }
 0x107   :  { %2931 = vsyncadd [#allocation12], 4294967232 }
 0x108   :  { %2932 = dma.done.wait [#allocation15], 64  }
 0x109   :  { %2933 = vsyncadd [#allocation15], 4294967232 }
 0x10a   :  { %2934 = dma.done.wait [#allocation18], 64  }
 0x10b   :  { %2935 = vsyncadd [#allocation18], 4294967232 }
 0x10c   :  { %2936 = dma.done.wait [#allocation21], 64  }
 0x10d   :  { %2937 = vsyncadd [#allocation21], 4294967232  ;;  %v2955_v0 = vmov 0.0   ;;  %vm2956_vm0 = vmmov 0   ;;  %s3756_s3 = sld [smem:[#allocation36_spill]]  ;;  %s3757_s27 = sld [smem:[#allocation32_spill]]  ;;  %v332_v15 = vlaneseq }
 0x10e   :  { %2329 = vmatprep.subr.bf16.mxu1 %v2955_v0  ;;  %2333 = vmatprep.mubr.msk.bf16.mxu1 %vm2956_vm0, %v2955_v0  ;;  %vm287_vm1 = vcmask 261120   ;;  %s3758_s16 = sld [smem:[#allocation34_spill]]  ;;  %v3356_v8 = vld [vmem:[#allocation2] ss:$0 sm:$0xff]  ;;  %s2957_s6 = smov 64   ;;  %vm456_vm2 = vcmask 1041408  }
 0x10f   :  { %2345 = vmatprep.subr.bf16.mxu0 %v2955_v0  ;;  %2347 = vmatprep.mubr.msk.bf16.mxu0 %vm2956_vm0, %v2955_v0  ;;  %s2958_s28 = smov 96   ;;  %v3364_v16 = vshrl.u32 %v332_v15, 7  ;;  %s3759_s19 = sld [smem:[#allocation35_spill]]  ;;  %vm413_vm3 = vcmask 31744   ;;  %vm540_vm4 = vcmask 1041409   ;;  %vm607_vm5 = vcmask 254976  }
 0x110   :  { %s3760_s21 = sld [smem:[#allocation38_spill]]  ;;  %s3761_s10 = sld [smem:[#allocation42_spill]] }
 0x111   :  { %v334_v17 = vsub.s32 7, %v3364_v16 }
 0x113   :  { %v3316_v1 = vld [vmem:[%s3756_s3] sm:$0xff]   ;;  %v3322_v2 = vld [vmem:[%s3756_s3 + $0x8] sm:$0xff]  }
 0x114   :  { %2330 = vmatpush3.bf16.msra.mxu1 %v3316_v1  ;;  %v3327_v3 = vld [vmem:[%s3757_s27] sm:$0xff]  ;;  %v3332_v4 = vld [vmem:[%s3757_s27 + $0x8] sm:$0xff] }
 0x115   :  { %2331 = vmatprep.subr.bf16.mxu1 %v2955_v0  ;;  %v268_v5 = vpack.c.bf16 %v3332_v4, %v3327_v3  ;;  %v3345_v6 = vld [vmem:[%s3758_s16] sm:$0xff]   ;;  %v3352_v7 = vld [vmem:[%s3758_s16 + $0x8] sm:$0xff]   ;;  %s3762_s16 = sld [smem:[#allocation33_spill]] }
 0x116   :  { %v257_v25 = vld [vmem:[%s3759_s19] sm:$0x3]  ;;  %v3395_v15 = vld [vmem:[%s3760_s21 + $0x8] sm:$0xff]  }
 0x117   :  { %v3374_v26 = vsel %vm456_vm2, %v257_v25, 0 }
 0x118   :  { %2332 = vmatpush3.bf16.msra.mxu1 %v3322_v2  ;;  %2346 = vmatpush3.bf16.msra.mxu0 %v3374_v26 }
 0x119   :  { %2337 = vmatprep.subr.bf16.mxu1 %v2955_v0  ;;  %2359 = vmatprep.subr.bf16.mxu0 %v2955_v0 }
 0x11b   :  { %2334 = vmatmul.mubr.msk.bf16.vlgmr.msra.gmra.mrb[0].mxu1 %vm287_vm1, %v268_v5 }
 0x11c   :  { %2341 = vmatprep.mubr.msk.bf16.mxu1 %vm2956_vm0, %v2955_v0  ;;  %2338 = vmatpush3.bf16.msra.mxu1 %v3345_v6 }
 0x11d   :  { %2339 = vmatprep.subr.bf16.mxu1 %v2955_v0 }
 0x120   :  { %2340 = vmatpush3.bf16.msra.mxu1 %v3352_v7 }
 0x121   :  { %2351 = vmatprep.subr.bf16.mxu1 %v2955_v0 }
 0x1ee   :  { %v325_v9 = vpop.f32.mrb[0].mxu1 }
 0x1ef   :  { %v326_v10 = vadd.f32 %v3356_v8, %v325_v9  ;;  %v2335_v11 = vpop.f32.mrb[1].mxu1 }
 0x1f0   :  { %v328_v12 = vpop.f32.mrb[2].mxu1 }
 0x1f1   :  { %501 = vrot.lane.b32.xlu1 %v326_v10, %s2957_s6  ;;  %342 = vrot.lane.b32.xlu0 %v326_v10, %s2958_s28  ;;  %v2336_v13 = vpop.f32.mrb[3].mxu1  ;;  %v329_v14 = vadd.f32 %v3356_v8, %v328_v12  ;;  %v335_v19 = vrot.slane %v326_v10, %v334_v17 }
 0x1f3   :  { %v339_v20 = vrot.slane %v329_v14, %v334_v17 }
 0x1f5   :  { %503 = vrot.lane.b32.xlu1 %v329_v14, %s2957_s6  ;;  %344 = vrot.lane.b32.xlu0 %v329_v14, %s2958_s28  ;;  %v3388_v14 = vld [vmem:[%s3760_s21] sm:$0xff]  }
 0x263   :  { %v343_v18 = vpop.permute.xlu0 %342  ;;  %v502_v17 = vpop.permute.xlu1 %501 }
 0x264   :  { %v348_v22 = vmul.f32 %v343_v18, %v335_v19 }
 0x267   :  { %v345_v21 = vpop.permute.xlu0 %344 }
 0x268   :  { %v349_v23 = vmul.f32 %v345_v21, %v339_v20  ;;  %v504_v21 = vpop.permute.xlu1 %503 }
 0x26a   :  { %v2254_v24 = vpack.c.bf16 %v349_v23, %v348_v22 }
 0x26c   :  { %2342 = vmatmul.mubr.msk.bf16.vlgmr.msra.gmra.mrb[4].mxu1 %vm287_vm1, %v2254_v24 }
 0x26d   :  { %2355 = vmatprep.mubr.msk.bf16.mxu1 %vm2956_vm0, %v2955_v0  ;;  %2352 = vmatpush3.bf16.msra.mxu1 %v3388_v14 }
 0x26e   :  { %2353 = vmatprep.subr.bf16.mxu1 %v2955_v0 }
 0x271   :  { %2354 = vmatpush3.bf16.msra.mxu1 %v3395_v15 }
 0x272   :  { %2367 = vmatprep.subr.bf16.mxu1 %v2955_v0 }
 0x33f   :  { %v406_v27 = vpop.f32.mrb[4].mxu1 }
 0x340   :  { %v414_v28 = vsel %vm413_vm3, %v406_v27, -inf  ;;  %v2343_v29 = vpop.f32.mrb[5].mxu1 }
 0x341   :  { %v415_v30 = vrot.slane %v414_v28, 4  ;;  %v409_v31 = vpop.f32.mrb[6].mxu1 }
 0x342   :  { %v421_v32 = vsel %vm413_vm3, %v409_v31, -inf  ;;  %v2344_v33 = vpop.f32.mrb[7].mxu1 }
 0x343   :  { %v416_v34 = vmax.f32 %v414_v28, %v415_v30  ;;  %v422_v35 = vrot.slane %v421_v32, 4 }
 0x345   :  { %v417_v36 = vrot.slane %v416_v34, 2  ;;  %v423_v37 = vmax.f32 %v421_v32, %v422_v35 }
 0x347   :  { %v418_v38 = vmax.f32 %v416_v34, %v417_v36  ;;  %v424_v39 = vrot.slane %v423_v37, 2 }
 0x349   :  { %v419_v40 = vrot.slane %v418_v38, 1  ;;  %v425_v41 = vmax.f32 %v423_v37, %v424_v39 }
 0x34b   :  { %v420_v42 = vmax.f32 %v418_v38, %v419_v40  ;;  %v426_v43 = vrot.slane %v425_v41, 1 }
 0x34d   :  { %v428_v44 = vsub.f32 %v406_v27, %v420_v42  ;;  %v427_v45 = vmax.f32 %v425_v41, %v426_v43 }
 0x34f   :  { %v430_v46 = vmul.f32 1.442695, %v428_v44  ;;  %v429_v47 = vsub.f32 %v409_v31, %v427_v45 }
 0x351   :  { %2576 = vpow2.f32 %v430_v46  ;;  %v432_v48 = vmul.f32 1.442695, %v429_v47  ;;  %v600_v46 = vrot.slane %v3327_v3, 7  ;;  %v601_v47 = vrot.slane %v3332_v4, 6 }
 0x353   :  { %2578 = vpow2.f32 %v432_v48  ;;  %v3407_v48 = vld [vmem:[#allocation5] ss:$0 sm:$0xff] }
 0x35b   :  { %v2577_v49 = vpop.eup %2576 }
 0x35c   :  { %v434_v50 = vsel %vm413_vm3, %v2577_v49, 0.0 }
 0x35d   :  { %v2579_v51 = vpop.eup %2578  ;;  %v435_v52 = vrot.slane %v434_v50, 4 }
 0x35e   :  { %v441_v53 = vsel %vm413_vm3, %v2579_v51, 0.0 }
 0x35f   :  { %v436_v54 = vadd.f32 %v435_v52, %v434_v50  ;;  %v442_v55 = vrot.slane %v441_v53, 4  ;;  %v602_v50 = vsel %vm540_vm4, %v601_v47, %v600_v46 }
 0x361   :  { %v437_v56 = vrot.slane %v436_v54, 2  ;;  %v443_v57 = vadd.f32 %v442_v55, %v441_v53 }
 0x363   :  { %v438_v58 = vadd.f32 %v437_v56, %v436_v54  ;;  %v444_v59 = vrot.slane %v443_v57, 2 }
 0x365   :  { %v439_v60 = vrot.slane %v438_v58, 1  ;;  %v445_v61 = vadd.f32 %v444_v59, %v443_v57 }
 0x367   :  { %v440_v62 = vadd.f32 %v439_v60, %v438_v58  ;;  %v446_v63 = vrot.slane %v445_v61, 1  ;;  %v2542_v60 = vld [vmem:[%s3761_s10] sm:$0xff]  }
 0x369   :  { %2580 = vrcp.f32 %v440_v62  ;;  %v447_v5 = vadd.f32 %v446_v63, %v445_v61  ;;  %v2543_v61 = vld [vmem:[%s3761_s10 + $0x8] sm:$0xff]   ;;  %v2544_v62 = vld [vmem:[%s3716_s12] sm:$0xff]  }
 0x36a   :  { %v2545_v63 = vld [vmem:[%s3716_s12 + $0x8] sm:$0xff]  }
 0x36b   :  { %2582 = vrcp.f32 %v447_v5  ;;  %v260_v5 = vld [vmem:[%s3762_s16] sm:$0xff] }
 0x373   :  { %v2581_v9 = vpop.eup %2580 }
 0x374   :  { %v450_v11 = vmul.f32 %v2581_v9, %v2577_v49  ;;  %v261_v9 = vld [vmem:[%s3762_s16 + $0x8] sm:$0xff] }
 0x375   :  { %v2583_v10 = vpop.eup %2582 }
 0x376   :  { %v451_v12 = vmul.f32 %v2583_v10, %v2579_v51  ;;  %v3434_v10 = vpack.c.bf16 %v261_v9, %v260_v5 }
 0x378   :  { %v452_v13 = vpack.c.bf16 %v451_v12, %v450_v11 }
 0x37a   :  { %2348 = vmatmul.mubr.msk.bf16.vlgmr.msra.gmra.mrb[0].mxu0 %vm413_vm3, %v452_v13 }
 0x37b   :  { %2363 = vmatprep.mubr.msk.bf16.mxu0 %vm2956_vm0, %v2955_v0  ;;  %2360 = vmatpush3.bf16.msra.mxu0 %v2542_v60 }
 0x37c   :  { %2361 = vmatprep.subr.bf16.mxu0 %v2955_v0 }
 0x37f   :  { %2362 = vmatpush3.bf16.msra.mxu0 %v2543_v61 }
 0x380   :  { %2375 = vmatprep.subr.bf16.mxu0 %v2955_v0 }
 0x44d   :  { %v494_v18 = vpop.f32.mrb[0].mxu0 }
 0x44e   :  { %v507_v19 = vmul.f32 %v502_v17, %v494_v18  ;;  %v2349_v20 = vpop.f32.mrb[1].mxu0  ;;  %v3443_v18 = vld [vmem:[#allocation7] ss:$0 sm:$0xff] }
 0x44f   :  { %v497_v22 = vpop.f32.mrb[2].mxu0  ;;  %v3445_v20 = vld [vmem:[#allocation8] ss:$0 sm:$0xff] }
 0x450   :  { %v509_v23 = vsel %vm287_vm1, %v507_v19, 0.0  ;;  %v508_v24 = vmul.f32 %v504_v21, %v497_v22  ;;  %v2350_v25 = vpop.f32.mrb[3].mxu0 }
 0x451   :  { %v510_v27 = vrot.slane %v509_v23, 4 }
 0x452   :  { %v516_v28 = vsel %vm287_vm1, %v508_v24, 0.0 }
 0x453   :  { %v511_v29 = vadd.f32 %v510_v27, %v509_v23  ;;  %v517_v30 = vrot.slane %v516_v28, 4  ;;  %v2156_v27 = vld [vmem:[#allocation11] ss:$0 sm:$0xff] }
 0x455   :  { %v512_v31 = vrot.slane %v511_v29, 2  ;;  %v518_v32 = vadd.f32 %v517_v30, %v516_v28 }
 0x457   :  { %v513_v33 = vadd.f32 %v512_v31, %v511_v29  ;;  %v519_v34 = vrot.slane %v518_v32, 2 }
 0x459   :  { %v514_v35 = vrot.slane %v513_v33, 1  ;;  %v520_v36 = vadd.f32 %v519_v34, %v518_v32  ;;  %v2959_v32 = vmov 1966171168  }
 0x45b   :  { %v515_v37 = vadd.f32 %v514_v35, %v513_v33  ;;  %v521_v38 = vrot.slane %v520_v36, 1  ;;  %v772_v33 = vunpack.c.l.s4 %v2959_v32  ;;  %v2152_v35 = vld [vmem:[#allocation10] ss:$0 sm:$0xff] }
 0x45d   :  { %v528_v39 = vpack.c.bf16 %v515_v37, %v515_v37  ;;  %v522_v40 = vadd.f32 %v521_v38, %v520_v36  ;;  %v773_v34 = vunpack.c.0.s8 %v772_v33 }
 0x45f   :  { %v529_v41 = vpack.c.bf16 %v522_v40, %v522_v40  ;;  %v538_v42 = vunpack.c.l.b16 %v528_v39  ;;  %v3463_v36 = vsub.s32 %v773_v34, %v3364_v16 }
 0x461   :  { %v539_v43 = vunpack.c.l.b16 %v529_v41 }
 0x463   :  { %v541_v44 = vsel %vm540_vm4, %v539_v43, %v538_v42  ;;  %v3467_v43 = vsub.s32 0, %v3364_v16 }
 0x464   :  { %v542_v45 = vpack.c.b16 %v541_v44, %v541_v44 }
 0x466   :  { %2356 = vmatmul.mubr.msk.bf16.vlgmr.msra.gmra.mrb[8].mxu1 %vm287_vm1, %v542_v45 }
 0x467   :  { %2371 = vmatprep.mubr.msk.bf16.mxu1 %vm2956_vm0, %v2955_v0  ;;  %2368 = vmatpush3.bf16.msra.mxu1 %v2544_v62 }
 0x468   :  { %2369 = vmatprep.subr.bf16.mxu1 %v2955_v0 }
 0x46b   :  { %2370 = vmatpush3.bf16.msra.mxu1 %v2545_v63 }
 0x46c   :  { %2383 = vmatprep.subr.bf16.mxu1 %v2955_v0 }
 0x46e   :  { %2372 = vmatmul.mubr.msk.bf16.vlgmr.msra.gmra.mrb[12].mxu1 %vm287_vm1, %v3434_v10 }
 0x46f   :  { %2384 = vmatpush3.bf16.msra.mxu1 %v3374_v26  ;;  %2385 = vmatprep.mubr.msk.bf16.mxu1 %vm2956_vm0, %v2955_v0 }
 0x470   :  { %2397 = vmatprep.subr.bf16.mxu1 %v2955_v0 }
 0x539   :  { %v592_v49 = vpop.f32.mrb[8].mxu1 }
 0x53a   :  { %v593_v51 = vadd.f32 %v3407_v48, %v592_v49  ;;  %v2357_v52 = vpop.f32.mrb[9].mxu1 }
 0x53b   :  { %v595_v53 = vpop.f32.mrb[10].mxu1 }
 0x53c   :  { %v2358_v54 = vpop.f32.mrb[11].mxu1  ;;  %v604_v55 = vadd.f32 %v602_v50, %v593_v51 }
 0x53e   :  { %v608_v56 = vsel %vm607_vm5, %v604_v55, 0.0 }
 0x53f   :  { %609 = vadd.xlane.f32.xlu0 %v608_v56 }
 0x541   :  { %v763_v24 = vpop.f32.mrb[12].mxu1 }
 0x542   :  { %v2373_v25 = vpop.f32.mrb[13].mxu1  ;;  %v764_v29 = vadd.f32 %v2156_v27, %v763_v24 }
 0x543   :  { %v766_v28 = vpop.f32.mrb[14].mxu1 }
 0x544   :  { %v2374_v30 = vpop.f32.mrb[15].mxu1  ;;  %v767_v31 = vadd.f32 %v2156_v27, %v766_v28 }
 0x555   :  { %941 = vrot.lane.b32.xlu0 %v764_v29, %s2958_s28 }
 0x5cc   :  { %v610_v57 = vpop.xlane.xlu0 %609 }
 0x5cd   :  { %v612_v58 = vmul.f32 0.03125, %v610_v57 }
 0x5cf   :  { %v613_v3 = vsub.f32 %v604_v55, %v612_v58 }
 0x5d1   :  { %v614_v59 = vmul.f32 %v613_v3, %v613_v3 }
 0x5d3   :  { %v615_v4 = vsel %vm607_vm5, %v614_v59, 0.0 }
 0x5d4   :  { %616 = vadd.xlane.f32.xlu1 %v615_v4 }
 0x5e5   :  { %943 = vrot.lane.b32.xlu1 %v767_v31, %s2958_s28 }
 0x661   :  { %v617_v11 = vpop.xlane.xlu1 %616 }
 0x662   :  { %v618_v12 = vmul.f32 0.03125, %v617_v11 }
 0x664   :  { %v619_v13 = vadd.f32 1e-05, %v618_v12 }
 0x666   :  { %2584 = vrsqrt.f32 %v619_v13 }
 0x670   :  { %v2585_v17 = vpop.eup %2584 }
 0x671   :  { %v621_v19 = vmul.f32 %v2585_v17, %v613_v3 }
 0x673   :  { %v628_v21 = vmul.f32 %v3443_v18, %v621_v19 }
 0x675   :  { %v3449_v22 = vadd.f32 %v3445_v20, %v628_v21 }
 0x677   :  { %v641_v23 = vpack.c.bf16 %v3449_v22, %v3449_v22 }
 0x679   :  { %2364 = vmatmul.mubr.msk.bf16.vlgmr.msra.gmra.mrb[4].mxu0 %vm287_vm1, %v641_v23 }
 0x67a   :  { %2376 = vmatpush3.bf16.msra.mxu0 %v3345_v6  ;;  %2379 = vmatprep.mubr.msk.bf16.mxu0 %vm2956_vm0, %v2955_v0 }
 0x67b   :  { %2377 = vmatprep.subr.bf16.mxu0 %v2955_v0 }
 0x67e   :  { %2378 = vmatpush3.bf16.msra.mxu0 %v3352_v7 }
 0x67f   :  { %2389 = vmatprep.subr.bf16.mxu0 %v2955_v0 }
 0x74c   :  { %v697_v37 = vpop.f32.mrb[4].mxu0 }
 0x74d   :  { %v698_v38 = vadd.f32 %v2152_v35, %v697_v37  ;;  %v2365_v39 = vpop.f32.mrb[5].mxu0 }
 0x74e   :  { %v700_v40 = vpop.f32.mrb[6].mxu0 }
 0x74f   :  { %v777_v41 = vrot.slane %v698_v38, %v3463_v36  ;;  %v2366_v42 = vpop.f32.mrb[7].mxu0 }
 0x751   :  { %v778_v44 = vcombine.high %v777_v41, %v777_v41  ;;  %v785_v45 = vrot.slane %v777_v41, %v3463_v36 }
 0x753   :  { %v796_v46 = vrot.slane %v785_v45, %v3467_v43  ;;  %v792_v47 = vrot.slane %v778_v44, %v3463_v36 }
 0x755   :  { %v800_v49 = vrot.slane %v792_v47, %v3467_v43  ;;  %v803_v50 = vmul.f32 %v796_v46, %v764_v29  ;;  %v2546_v47 = vld [vmem:[%s3718_s14] sm:$0xff]  }
 0x757   :  { %v804_v51 = vmul.f32 %v800_v49, %v767_v31  ;;  %v2547_v49 = vld [vmem:[%s3718_s14 + $0x8] sm:$0xff]  }
 0x759   :  { %v2255_v52 = vpack.c.bf16 %v804_v51, %v803_v50  ;;  %v942_v50 = vpop.permute.xlu0 %941 }
 0x75b   :  { %2380 = vmatmul.mubr.msk.bf16.vlgmr.msra.gmra.mrb[8].mxu0 %vm287_vm1, %v2255_v52 }
 0x75c   :  { %2393 = vmatprep.mubr.msk.bf16.mxu0 %vm2956_vm0, %v2955_v0  ;;  %2390 = vmatpush3.bf16.msra.mxu0 %v2546_v47  ;;  %v2554_v47 = vld [vmem:[%s3724_s20 + $0x20] sm:$0xff]  }
 0x75d   :  { %2391 = vmatprep.subr.bf16.mxu0 %v2955_v0 }
 0x760   :  { %2392 = vmatpush3.bf16.msra.mxu0 %v2547_v49  ;;  %v2555_v49 = vld [vmem:[%s3724_s20 + $0x28] sm:$0xff]  }
 0x761   :  { %2405 = vmatprep.subr.bf16.mxu0 %v2955_v0 }
 0x82e   :  { %v849_v53 = vpop.f32.mrb[8].mxu0 }
 0x82f   :  { %v856_v16 = vsel %vm413_vm3, %v849_v53, -inf  ;;  %v2381_v54 = vpop.f32.mrb[9].mxu0 }
 0x830   :  { %v857_v55 = vrot.slane %v856_v16, 4  ;;  %v852_v56 = vpop.f32.mrb[10].mxu0 }
 0x831   :  { %v863_v57 = vsel %vm413_vm3, %v852_v56, -inf  ;;  %v2382_v58 = vpop.f32.mrb[11].mxu0 }
 0x832   :  { %v858_v3 = vmax.f32 %v856_v16, %v857_v55  ;;  %v864_v59 = vrot.slane %v863_v57, 4  ;;  %v944_v16 = vpop.permute.xlu1 %943 }
 0x834   :  { %v859_v4 = vrot.slane %v858_v3, 2  ;;  %v865_v60 = vmax.f32 %v863_v57, %v864_v59 }
 0x836   :  { %v860_v61 = vmax.f32 %v858_v3, %v859_v4  ;;  %v866_v62 = vrot.slane %v865_v60, 2 }
 0x838   :  { %v861_v63 = vrot.slane %v860_v61, 1  ;;  %v867_v5 = vmax.f32 %v865_v60, %v866_v62 }
 0x83a   :  { %v862_v9 = vmax.f32 %v860_v61, %v861_v63  ;;  %v868_v11 = vrot.slane %v867_v5, 1 }
 0x83c   :  { %v870_v12 = vsub.f32 %v849_v53, %v862_v9  ;;  %v869_v13 = vmax.f32 %v867_v5, %v868_v11 }
 0x83e   :  { %v872_v17 = vmul.f32 1.442695, %v870_v12  ;;  %v871_v19 = vsub.f32 %v852_v56, %v869_v13 }
 0x840   :  { %2586 = vpow2.f32 %v872_v17  ;;  %v874_v21 = vmul.f32 1.442695, %v871_v19 }
 0x842   :  { %2588 = vpow2.f32 %v874_v21 }
 0x84a   :  { %v2587_v23 = vpop.eup %2586 }
 0x84b   :  { %v876_v24 = vsel %vm413_vm3, %v2587_v23, 0.0 }
 0x84c   :  { %v2589_v25 = vpop.eup %2588  ;;  %v877_v27 = vrot.slane %v876_v24, 4 }
 0x84d   :  { %v883_v28 = vsel %vm413_vm3, %v2589_v25, 0.0 }
 0x84e   :  { %v878_v29 = vadd.f32 %v877_v27, %v876_v24  ;;  %v884_v30 = vrot.slane %v883_v28, 4  ;;  %v2163_v27 = vld [vmem:[#allocation13] ss:$0 sm:$0xff] }
 0x850   :  { %v879_v31 = vrot.slane %v878_v29, 2  ;;  %v885_v32 = vadd.f32 %v884_v30, %v883_v28 }
 0x852   :  { %v880_v33 = vadd.f32 %v879_v31, %v878_v29  ;;  %v886_v34 = vrot.slane %v885_v32, 2 }
 0x854   :  { %v881_v35 = vrot.slane %v880_v33, 1  ;;  %v887_v37 = vadd.f32 %v886_v34, %v885_v32 }
 0x856   :  { %v882_v38 = vadd.f32 %v881_v35, %v880_v33  ;;  %v888_v39 = vrot.slane %v887_v37, 1 }
 0x858   :  { %2590 = vrcp.f32 %v882_v38  ;;  %v889_v40 = vadd.f32 %v888_v39, %v887_v37 }
 0x85a   :  { %2592 = vrcp.f32 %v889_v40 }
 0x862   :  { %v2591_v41 = vpop.eup %2590 }
 0x863   :  { %v892_v44 = vmul.f32 %v2591_v41, %v2587_v23  ;;  %v2548_v41 = vld [vmem:[%s3722_s18] sm:$0xff]  }
 0x864   :  { %v2593_v42 = vpop.eup %2592 }
 0x865   :  { %v893_v45 = vmul.f32 %v2593_v42, %v2589_v25  ;;  %v2550_v42 = vld [vmem:[%s3724_s20] sm:$0xff]  }
 0x867   :  { %v894_v46 = vpack.c.bf16 %v893_v45, %v892_v44  ;;  %v2551_v44 = vld [vmem:[%s3724_s20 + $0x8] sm:$0xff]   ;;  %v2552_v45 = vld [vmem:[%s3724_s20 + $0x10] sm:$0xff]  }
 0x869   :  { %2386 = vmatmul.mubr.msk.bf16.vlgmr.msra.gmra.mrb[16].mxu1 %vm413_vm3, %v894_v46  ;;  %v2553_v46 = vld [vmem:[%s3724_s20 + $0x18] sm:$0xff]  }
 0x86a   :  { %2401 = vmatprep.mubr.msk.bf16.mxu1 %vm2956_vm0, %v2955_v0  ;;  %2398 = vmatpush3.bf16.msra.mxu1 %v2548_v41 }
 0x86b   :  { %2399 = vmatprep.subr.bf16.mxu1 %v2955_v0 }
 0x93c   :  { %v932_v51 = vpop.f32.mrb[16].mxu1 }
 0x93d   :  { %v947_v52 = vmul.f32 %v942_v50, %v932_v51  ;;  %v2387_v53 = vpop.f32.mrb[17].mxu1 }
 0x93e   :  { %v935_v54 = vpop.f32.mrb[18].mxu1 }
 0x93f   :  { %v949_v55 = vsel %vm287_vm1, %v947_v52, 0.0  ;;  %v948_v56 = vmul.f32 %v944_v16, %v935_v54  ;;  %v2388_v57 = vpop.f32.mrb[19].mxu1  ;;  %v2167_v16 = vld [vmem:[#allocation14] ss:$0 sm:$0xff] }
 0x940   :  { %v950_v58 = vrot.slane %v949_v55, 4 }
 0x941   :  { %v956_v3 = vsel %vm287_vm1, %v948_v56, 0.0 }
 0x942   :  { %v951_v59 = vadd.f32 %v950_v58, %v949_v55  ;;  %v957_v4 = vrot.slane %v956_v3, 4  ;;  %v2168_v55 = vld [vmem:[#allocation16] ss:$0 sm:$0xff] }
 0x944   :  { %v952_v60 = vrot.slane %v951_v59, 2  ;;  %v958_v61 = vadd.f32 %v957_v4, %v956_v3  ;;  %v2556_v3 = vld [vmem:[%s3724_s20 + $0x30] sm:$0xff]  }
 0x946   :  { %v953_v62 = vadd.f32 %v952_v60, %v951_v59  ;;  %v959_v63 = vrot.slane %v958_v61, 2  ;;  %v2169_v59 = vld [vmem:[#allocation17] ss:$0 sm:$0xff] }
 0x948   :  { %v954_v5 = vrot.slane %v953_v62, 1  ;;  %v960_v9 = vadd.f32 %v959_v63, %v958_v61 }
 0x94a   :  { %v955_v11 = vadd.f32 %v954_v5, %v953_v62  ;;  %v961_v12 = vrot.slane %v960_v9, 1 }
 0x94c   :  { %v968_v13 = vpack.c.bf16 %v955_v11, %v955_v11  ;;  %v962_v17 = vadd.f32 %v961_v12, %v960_v9  ;;  %v2173_v9 = vld [vmem:[#allocation19] ss:$0 sm:$0xff] }
 0x94e   :  { %v969_v19 = vpack.c.bf16 %v962_v17, %v962_v17  ;;  %v978_v21 = vunpack.c.l.b16 %v968_v13 }
 0x950   :  { %v979_v23 = vunpack.c.l.b16 %v969_v19 }
 0x952   :  { %v980_v24 = vsel %vm540_vm4, %v979_v23, %v978_v21 }
 0x953   :  { %v981_v25 = vpack.c.b16 %v980_v24, %v980_v24 }
 0x955   :  { %2394 = vmatmul.mubr.msk.bf16.vlgmr.msra.gmra.mrb[12].mxu0 %vm287_vm1, %v981_v25 }
 0x956   :  { %2421 = vmatprep.mubr.msk.bf16.mxu0 %vm2956_vm0, %v2955_v0  ;;  %2406 = vmatpush3.bf16.msra.mxu0 %v2550_v42 }
 0x957   :  { %2407 = vmatprep.subr.bf16.mxu0 %v2955_v0 }
 0x95a   :  { %2408 = vmatpush3.bf16.msra.mxu0 %v2551_v44 }
 0x95b   :  { %2409 = vmatprep.subr.bf16.mxu0 %v2955_v0 }
 0x95e   :  { %2410 = vmatpush3.bf16.msra.mxu0 %v2552_v45 }
 0x95f   :  { %2411 = vmatprep.subr.bf16.mxu0 %v2955_v0 }
 0x962   :  { %2412 = vmatpush3.bf16.msra.mxu0 %v2553_v46 }
 0x963   :  { %2413 = vmatprep.subr.bf16.mxu0 %v2955_v0 }
 0x966   :  { %2414 = vmatpush3.bf16.msra.mxu0 %v2554_v47 }
 0x967   :  { %2415 = vmatprep.subr.bf16.mxu0 %v2955_v0 }
 0x96a   :  { %2416 = vmatpush3.bf16.msra.mxu0 %v2555_v49 }
 0x96b   :  { %2417 = vmatprep.subr.bf16.mxu0 %v2955_v0 }
 0x96e   :  { %2418 = vmatpush3.bf16.msra.mxu0 %v2556_v3 }
 0x96f   :  { %2419 = vmatprep.subr.bf16.mxu0 %v2955_v0 }
 0xa28   :  { %v1031_v28 = vpop.f32.mrb[12].mxu0 }
 0xa29   :  { %v1032_v29 = vadd.f32 %v2163_v27, %v1031_v28  ;;  %v2395_v30 = vpop.f32.mrb[13].mxu0 }
 0xa2a   :  { %v1034_v31 = vpop.f32.mrb[14].mxu0 }
 0xa2b   :  { %v2396_v32 = vpop.f32.mrb[15].mxu0  ;;  %v1037_v33 = vadd.f32 %v1032_v29, %v3449_v22  ;;  %v2549_v22 = vld [vmem:[%s3722_s18 + $0x8] sm:$0xff]  }
 0xa2c   :  { %2400 = vmatpush3.bf16.msra.mxu1 %v2549_v22  ;;  %v2182_v32 = vld [vmem:[#allocation20] ss:$0 sm:$0xff] }
 0xa2d   :  { %v1040_v34 = vsel %vm607_vm5, %v1037_v33, 0.0  ;;  %2425 = vmatprep.subr.bf16.mxu1 %v2955_v0 }
 0xa2e   :  { %1041 = vadd.xlane.f32.xlu0 %v1040_v34  ;;  %v2183_v34 = vld [vmem:[#allocation22] ss:$0 sm:$0xff] }
 0xabb   :  { %v1042_v35 = vpop.xlane.xlu0 %1041 }
 0xabc   :  { %v1043_v37 = vmul.f32 0.03125, %v1042_v35 }
 0xabe   :  { %v1044_v38 = vsub.f32 %v1037_v33, %v1043_v37 }
 0xac0   :  { %v1045_v39 = vmul.f32 %v1044_v38, %v1044_v38 }
 0xac2   :  { %v1046_v40 = vsel %vm607_vm5, %v1045_v39, 0.0 }
 0xac3   :  { %1047 = vadd.xlane.f32.xlu1 %v1046_v40 }
 0xb50   :  { %v1048_v50 = vpop.xlane.xlu1 %1047 }
 0xb51   :  { %v1049_v51 = vmul.f32 0.03125, %v1048_v50 }
 0xb53   :  { %v1050_v52 = vadd.f32 1e-05, %v1049_v51 }
 0xb55   :  { %2594 = vrsqrt.f32 %v1050_v52 }
 0xb5f   :  { %v2595_v53 = vpop.eup %2594 }
 0xb60   :  { %v1052_v54 = vmul.f32 %v2595_v53, %v1044_v38 }
 0xb62   :  { %v1059_v56 = vmul.f32 %v2167_v16, %v1052_v54 }
 0xb64   :  { %v1066_v57 = vadd.f32 %v2168_v55, %v1059_v56  ;;  %v2558_v55 = vld [vmem:[%s3761_s10 + $0x10] sm:$0xff]  }
 0xb66   :  { %v1072_v58 = vpack.c.bf16 %v1066_v57, %v1066_v57 }
 0xb68   :  { %2402 = vmatmul.mubr.msk.bf16.vlgmr.msra.gmra.mrb[20].mxu1 %vm287_vm1, %v1072_v58 }
 0xb69   :  { %2426 = vmatpush3.bf16.msra.mxu1 %v3316_v1  ;;  %2429 = vmatprep.mubr.msk.bf16.mxu1 %vm2956_vm0, %v2955_v0  ;;  %v2557_v1 = vld [vmem:[%s3724_s20 + $0x38] sm:$0xff]  }
 0xb6a   :  { %2427 = vmatprep.subr.bf16.mxu1 %v2955_v0  ;;  %2420 = vmatpush3.bf16.msra.mxu0 %v2557_v1 }
 0xb6b   :  { %2457 = vmatprep.subr.bf16.mxu0 %v2955_v0 }
 0xb6d   :  { %2428 = vmatpush3.bf16.msra.mxu1 %v3322_v2 }
 0xb6e   :  { %2433 = vmatprep.subr.bf16.mxu1 %v2955_v0 }
 0xc3b   :  { %v1128_v4 = vpop.f32.mrb[20].mxu1 }
 0xc3c   :  { %v1129_v60 = vadd.f32 %v2169_v59, %v1128_v4  ;;  %v2403_v2 = vpop.f32.mrb[21].mxu1 }
 0xc3d   :  { %v1131_v61 = vpop.f32.mrb[22].mxu1 }
 0xc3e   :  { %v1134_v62 = vmax.f32 %v1129_v60, 0.0  ;;  %v2404_v63 = vpop.f32.mrb[23].mxu1  ;;  %v2560_v60 = vld [vmem:[%s3716_s12 + $0x10] sm:$0xff]   ;;  %v2561_v61 = vld [vmem:[%s3716_s12 + $0x18] sm:$0xff]  }
 0xc40   :  { %v1152_v5 = vpack.c.bf16 %v1134_v62, %v1134_v62 }
 0xc42   :  { %2422 = vmatmul.mubr.bf16.vlgmr.msra.gmra.mrb[16].mxu0 %v1152_v5 }
 0xc43   :  { %2458 = vmatpush3.bf16.msra.mxu0 %v3345_v6  ;;  %2461 = vmatprep.mubr.msk.bf16.mxu0 %vm2956_vm0, %v2955_v0 }
 0xc44   :  { %2459 = vmatprep.subr.bf16.mxu0 %v2955_v0 }
 0xc47   :  { %2460 = vmatpush3.bf16.msra.mxu0 %v3352_v7 }
 0xc48   :  { %2471 = vmatprep.subr.bf16.mxu0 %v2955_v0 }
 0xd15   :  { %v1241_v11 = vpop.f32.mrb[16].mxu0 }
 0xd16   :  { %v1242_v12 = vadd.f32 %v2173_v9, %v1241_v11  ;;  %v2423_v13 = vpop.f32.mrb[17].mxu0 }
 0xd17   :  { %v1244_v17 = vpop.f32.mrb[18].mxu0 }
 0xd18   :  { %v2424_v19 = vpop.f32.mrb[19].mxu0  ;;  %v1247_v21 = vadd.f32 %v1242_v12, %v1066_v57  ;;  %v2198_v17 = vld [vmem:[#allocation11 + $0x1] ss:$0 sm:$0xff] }
 0xd1a   :  { %v1250_v23 = vsel %vm607_vm5, %v1247_v21, 0.0 }
 0xd1b   :  { %1251 = vadd.xlane.f32.xlu0 %v1250_v23 }
 0xda8   :  { %v1252_v6 = vpop.xlane.xlu0 %1251 }
 0xda9   :  { %v1253_v24 = vmul.f32 0.03125, %v1252_v6 }
 0xdab   :  { %v1254_v25 = vsub.f32 %v1247_v21, %v1253_v24 }
 0xdad   :  { %v1255_v27 = vmul.f32 %v1254_v25, %v1254_v25 }
 0xdaf   :  { %v1256_v28 = vsel %vm607_vm5, %v1255_v27, 0.0 }
 0xdb0   :  { %1257 = vadd.xlane.f32.xlu0 %v1256_v28 }
 0xe3d   :  { %v1258_v7 = vpop.xlane.xlu0 %1257 }
 0xe3e   :  { %v1259_v29 = vmul.f32 0.03125, %v1258_v7 }
 0xe40   :  { %v1260_v30 = vadd.f32 1e-05, %v1259_v29 }
 0xe42   :  { %2596 = vrsqrt.f32 %v1260_v30 }
 0xe4c   :  { %v2597_v31 = vpop.eup %2596 }
 0xe4d   :  { %v1262_v33 = vmul.f32 %v2597_v31, %v1254_v25 }
 0xe4f   :  { %v1269_v35 = vmul.f32 %v2182_v32, %v1262_v33 }
 0xe51   :  { %v1276_v37 = vadd.f32 %v2183_v34, %v1269_v35 }
 0xe53   :  { %v1277_v38 = vpack.c.bf16 %v1276_v37, %v1276_v37 }
 0xe55   :  { %2430 = vmatmul.mubr.msk.bf16.vlgmr.msra.gmra.mrb[24].mxu1 %vm287_vm1, %v1277_v38 }
 0xe56   :  { %2434 = vmatpush3.bf16.msra.mxu1 %v3388_v14  ;;  %2437 = vmatprep.mubr.msk.bf16.mxu1 %vm2956_vm0, %v2955_v0 }
 0xe57   :  { %2435 = vmatprep.subr.bf16.mxu1 %v2955_v0 }
 0xe5a   :  { %2436 = vmatpush3.bf16.msra.mxu1 %v3395_v15 }
 0xe5b   :  { %2441 = vmatprep.subr.bf16.mxu1 %v2955_v0 }
 0xf28   :  { %v1315_v39 = vpop.f32.mrb[24].mxu1 }
 0xf29   :  { %v1316_v40 = vadd.f32 %v3356_v8, %v1315_v39  ;;  %v2431_v41 = vpop.f32.mrb[25].mxu1 }
 0xf2a   :  { %v1318_v22 = vpop.f32.mrb[26].mxu1 }
 0xf2b   :  { %v1321_v42 = vpack.c.bf16 %v1316_v40, %v1316_v40  ;;  %v2432_v44 = vpop.f32.mrb[27].mxu1 }
 0xf2d   :  { %1323 = vrot.lane.b32.xlu1 %v1321_v42, %s2957_s6 }
 0xf9f   :  { %v1324_v45 = vpop.permute.xlu1 %1323 }
 0xfa0   :  { %2438 = vmatmul.mubr.msk.bf16.vlgmr.msra.gmra.mrb[28].mxu1 %vm287_vm1, %v1324_v45 }
 0xfa1   :  { %2445 = vmatprep.mubr.msk.bf16.mxu1 %vm2956_vm0, %v2955_v0  ;;  %2442 = vmatpush3.bf16.msra.mxu1 %v2558_v55 }
 0xfa2   :  { %2443 = vmatprep.subr.bf16.mxu1 %v2955_v0 }
0x1073   :  { %v1362_v14 = vpop.f32.mrb[28].mxu1 }
0x1074   :  { %v1363_v15 = vadd.f32 %v3407_v48, %v1362_v14  ;;  %v2439_v46 = vpop.f32.mrb[29].mxu1  ;;  %v2559_v48 = vld [vmem:[%s3761_s10 + $0x18] sm:$0xff]  }
0x1075   :  { %v1365_v47 = vpop.f32.mrb[30].mxu1  ;;  %2444 = vmatpush3.bf16.msra.mxu1 %v2559_v48 }
0x1076   :  { %v2440_v49 = vpop.f32.mrb[31].mxu1  ;;  %v1368_v50 = vadd.f32 %v1363_v15, %v1276_v37  ;;  %2449 = vmatprep.subr.bf16.mxu1 %v2955_v0 }
0x1078   :  { %v1369_v8 = vsel %vm607_vm5, %v1368_v50, 0.0 }
0x1079   :  { %1370 = vadd.xlane.f32.xlu0 %v1369_v8 }
0x1106   :  { %v1371_v51 = vpop.xlane.xlu0 %1370 }
0x1107   :  { %v1372_v52 = vmul.f32 0.03125, %v1371_v51 }
0x1109   :  { %v1373_v53 = vsub.f32 %v1368_v50, %v1372_v52 }
0x110b   :  { %v1374_v16 = vmul.f32 %v1373_v53, %v1373_v53 }
0x110d   :  { %v1375_v54 = vsel %vm607_vm5, %v1374_v16, 0.0 }
0x110e   :  { %1376 = vadd.xlane.f32.xlu0 %v1375_v54 }
0x119b   :  { %v1377_v56 = vpop.xlane.xlu0 %1376 }
0x119c   :  { %v1378_v57 = vmul.f32 0.03125, %v1377_v56 }
0x119e   :  { %v1379_v58 = vadd.f32 1e-05, %v1378_v57 }
0x11a0   :  { %2598 = vrsqrt.f32 %v1379_v58 }
0x11aa   :  { %v2599_v3 = vpop.eup %2598 }
0x11ab   :  { %v1381_v1 = vmul.f32 %v2599_v3, %v1373_v53 }
0x11ad   :  { %v1382_v59 = vmul.f32 %v3443_v18, %v1381_v1  ;;  %v2190_v18 = vld [vmem:[#allocation10 + $0x1] ss:$0 sm:$0xff] }
0x11af   :  { %v3580_v4 = vadd.f32 %v3445_v20, %v1382_v59 }
0x11b1   :  { %v1391_v2 = vpack.c.bf16 %v3580_v4, %v3580_v4 }
0x11b3   :  { %2446 = vmatmul.mubr.msk.bf16.vlgmr.msra.gmra.mrb[32].mxu1 %vm287_vm1, %v1391_v2 }
0x11b4   :  { %2450 = vmatpush3.bf16.msra.mxu1 %v2560_v60  ;;  %2453 = vmatprep.mubr.msk.bf16.mxu1 %vm2956_vm0, %v2955_v0 }
0x11b5   :  { %2451 = vmatprep.subr.bf16.mxu1 %v2955_v0 }
0x11b8   :  { %2452 = vmatpush3.bf16.msra.mxu1 %v2561_v61 }
0x11b9   :  { %2465 = vmatprep.subr.bf16.mxu1 %v2955_v0 }
0x11bb   :  { %2454 = vmatmul.mubr.msk.bf16.vlgmr.msra.gmra.mrb[36].mxu1 %vm287_vm1, %v3434_v10 }
0x11bc   :  { %2466 = vmatpush3.bf16.msra.mxu1 %v3374_v26  ;;  %2467 = vmatprep.mubr.msk.bf16.mxu1 %vm2956_vm0, %v2955_v0 }
0x11bd   :  { %2479 = vmatprep.subr.bf16.mxu1 %v2955_v0 }
0x1286   :  { %v1447_v20 = vpop.f32.mrb[32].mxu1 }
0x1287   :  { %v1448_v62 = vadd.f32 %v2190_v18, %v1447_v20  ;;  %v2447_v63 = vpop.f32.mrb[33].mxu1 }
0x1288   :  { %v1450_v5 = vpop.f32.mrb[34].mxu1  ;;  %v2562_v63 = vld [vmem:[%s3718_s14 + $0x10] sm:$0xff]  }
0x1289   :  { %v1526_v9 = vrot.slane %v1448_v62, %v3463_v36  ;;  %v2448_v11 = vpop.f32.mrb[35].mxu1  ;;  %v2563_v5 = vld [vmem:[%s3718_s14 + $0x18] sm:$0xff]  }
0x128b   :  { %v1527_v12 = vcombine.high %v1526_v9, %v1526_v9  ;;  %v1534_v13 = vrot.slane %v1526_v9, %v3463_v36 }
0x128d   :  { %v1541_v10 = vrot.slane %v1527_v12, %v3463_v36  ;;  %v1545_v21 = vrot.slane %v1534_v13, %v3467_v43 }
0x128e   :  { %v1512_v26 = vpop.f32.mrb[36].mxu1 }
0x128f   :  { %v1513_v19 = vadd.f32 %v2198_v17, %v1512_v26  ;;  %v2455_v23 = vpop.f32.mrb[37].mxu1  ;;  %v1549_v27 = vrot.slane %v1541_v10, %v3467_v43 }
0x1290   :  { %v1515_v6 = vpop.f32.mrb[38].mxu1 }
0x1291   :  { %v1552_v24 = vmul.f32 %v1545_v21, %v1513_v19  ;;  %v1516_v25 = vadd.f32 %v2198_v17, %v1515_v6  ;;  %1690 = vrot.lane.b32.xlu0 %v1513_v19, %s2958_s28  ;;  %v2456_v28 = vpop.f32.mrb[39].mxu1 }
0x1293   :  { %v1553_v7 = vmul.f32 %v1549_v27, %v1516_v25  ;;  %1692 = vrot.lane.b32.xlu1 %v1516_v25, %s2958_s28 }
0x1295   :  { %v2256_v29 = vpack.c.bf16 %v1553_v7, %v1552_v24 }
0x1297   :  { %2462 = vmatmul.mubr.msk.bf16.vlgmr.msra.gmra.mrb[20].mxu0 %vm287_vm1, %v2256_v29 }
0x1298   :  { %2475 = vmatprep.mubr.msk.bf16.mxu0 %vm2956_vm0, %v2955_v0  ;;  %2472 = vmatpush3.bf16.msra.mxu0 %v2562_v63  ;;  %v2219_v63 = vld [vmem:[#allocation17 + $0x1] ss:$0 sm:$0xff] }
0x1299   :  { %2473 = vmatprep.subr.bf16.mxu0 %v2955_v0 }
0x129c   :  { %2474 = vmatpush3.bf16.msra.mxu0 %v2563_v5 }
0x129d   :  { %2487 = vmatprep.subr.bf16.mxu0 %v2955_v0 }
0x1303   :  { %v1691_v9 = vpop.permute.xlu0 %1690 }
0x1305   :  { %v1693_v17 = vpop.permute.xlu1 %1692 }
0x136a   :  { %v1598_v36 = vpop.f32.mrb[20].mxu0 }
0x136b   :  { %v1605_v30 = vsel %vm413_vm3, %v1598_v36, -inf  ;;  %v2463_v31 = vpop.f32.mrb[21].mxu0 }
0x136c   :  { %v1606_v32 = vrot.slane %v1605_v30, 4  ;;  %v1601_v33 = vpop.f32.mrb[22].mxu0 }
0x136d   :  { %v1612_v43 = vsel %vm413_vm3, %v1601_v33, -inf  ;;  %v2464_v34 = vpop.f32.mrb[23].mxu0 }
0x136e   :  { %v1607_v35 = vmax.f32 %v1605_v30, %v1606_v32  ;;  %v1613_v37 = vrot.slane %v1612_v43, 4 }
0x1370   :  { %v1608_v38 = vrot.slane %v1607_v35, 2  ;;  %v1614_v39 = vmax.f32 %v1612_v43, %v1613_v37 }
0x1372   :  { %v1609_v40 = vmax.f32 %v1607_v35, %v1608_v38  ;;  %v1615_v41 = vrot.slane %v1614_v39, 2 }
0x1374   :  { %v1610_v22 = vrot.slane %v1609_v40, 1  ;;  %v1616_v42 = vmax.f32 %v1614_v39, %v1615_v41 }
0x1376   :  { %v1611_v44 = vmax.f32 %v1609_v40, %v1610_v22  ;;  %v1617_v45 = vrot.slane %v1616_v42, 1  ;;  %v2209_v40 = vld [vmem:[#allocation13 + $0x1] ss:$0 sm:$0xff] }
0x1378   :  { %v1619_v14 = vsub.f32 %v1598_v36, %v1611_v44  ;;  %v1618_v15 = vmax.f32 %v1616_v42, %v1617_v45 }
0x137a   :  { %v1621_v46 = vmul.f32 1.442695, %v1619_v14  ;;  %v1620_v47 = vsub.f32 %v1601_v33, %v1618_v15 }
0x137c   :  { %2600 = vpow2.f32 %v1621_v46  ;;  %v1623_v49 = vmul.f32 1.442695, %v1620_v47 }
0x137e   :  { %2602 = vpow2.f32 %v1623_v49 }
0x1386   :  { %v2601_v50 = vpop.eup %2600 }
0x1387   :  { %v1625_v8 = vsel %vm413_vm3, %v2601_v50, 0.0 }
0x1388   :  { %v2603_v51 = vpop.eup %2602  ;;  %v1626_v52 = vrot.slane %v1625_v8, 4 }
0x1389   :  { %v1632_v53 = vsel %vm413_vm3, %v2603_v51, 0.0 }
0x138a   :  { %v1627_v16 = vadd.f32 %v1626_v52, %v1625_v8  ;;  %v1633_v54 = vrot.slane %v1632_v53, 4  ;;  %v2566_v52 = vld [vmem:[%s3724_s20 + $0x40] sm:$0xff]  }
0x138c   :  { %v1628_v55 = vrot.slane %v1627_v16, 2  ;;  %v1634_v48 = vadd.f32 %v1633_v54, %v1632_v53  ;;  %v2567_v53 = vld [vmem:[%s3724_s20 + $0x48] sm:$0xff]   ;;  %v2569_v54 = vld [vmem:[%s3724_s20 + $0x58] sm:$0xff]  }
0x138e   :  { %v1629_v56 = vadd.f32 %v1628_v55, %v1627_v16  ;;  %v1635_v57 = vrot.slane %v1634_v48, 2  ;;  %v2568_v16 = vld [vmem:[%s3724_s20 + $0x50] sm:$0xff]   ;;  %v2570_v55 = vld [vmem:[%s3724_s20 + $0x60] sm:$0xff]  }
0x1390   :  { %v1630_v58 = vrot.slane %v1629_v56, 1  ;;  %v1636_v3 = vadd.f32 %v1635_v57, %v1634_v48  ;;  %v2571_v48 = vld [vmem:[%s3724_s20 + $0x68] sm:$0xff]  }
0x1392   :  { %v1631_v1 = vadd.f32 %v1630_v58, %v1629_v56  ;;  %v1637_v59 = vrot.slane %v1636_v3, 1 }
0x1394   :  { %2604 = vrcp.f32 %v1631_v1  ;;  %v1638_v60 = vadd.f32 %v1637_v59, %v1636_v3  ;;  %v2213_v1 = vld [vmem:[#allocation14 + $0x1] ss:$0 sm:$0xff] }
0x1396   :  { %2606 = vrcp.f32 %v1638_v60  ;;  %v2214_v60 = vld [vmem:[#allocation16 + $0x1] ss:$0 sm:$0xff] }
0x139e   :  { %v2605_v2 = vpop.eup %2604 }
0x139f   :  { %v1641_v18 = vmul.f32 %v2605_v2, %v2601_v50 }
0x13a0   :  { %v2607_v61 = vpop.eup %2606 }
0x13a1   :  { %v1642_v20 = vmul.f32 %v2607_v61, %v2603_v51  ;;  %v2564_v51 = vld [vmem:[%s3722_s18 + $0x10] sm:$0xff]  }
0x13a3   :  { %v1643_v62 = vpack.c.bf16 %v1642_v20, %v1641_v18  ;;  %v2572_v20 = vld [vmem:[%s3724_s20 + $0x70] sm:$0xff]  }
0x13a5   :  { %2468 = vmatmul.mubr.msk.bf16.vlgmr.msra.gmra.mrb[40].mxu1 %vm413_vm3, %v1643_v62  ;;  %v2573_v62 = vld [vmem:[%s3724_s20 + $0x78] sm:$0xff]  }
0x13a6   :  { %2483 = vmatprep.mubr.msk.bf16.mxu1 %vm2956_vm0, %v2955_v0  ;;  %2480 = vmatpush3.bf16.msra.mxu1 %v2564_v51 }
0x13a7   :  { %2481 = vmatprep.subr.bf16.mxu1 %v2955_v0 }
0x1478   :  { %v1681_v11 = vpop.f32.mrb[40].mxu1 }
0x1479   :  { %v1696_v12 = vmul.f32 %v1691_v9, %v1681_v11  ;;  %v2469_v13 = vpop.f32.mrb[41].mxu1 }
0x147a   :  { %v1684_v10 = vpop.f32.mrb[42].mxu1 }
0x147b   :  { %v1698_v26 = vsel %vm287_vm1, %v1696_v12, 0.0  ;;  %v1697_v19 = vmul.f32 %v1693_v17, %v1684_v10  ;;  %v2470_v21 = vpop.f32.mrb[43].mxu1 }
0x147c   :  { %v1699_v23 = vrot.slane %v1698_v26, 4 }
0x147d   :  { %v1705_v6 = vsel %vm287_vm1, %v1697_v19, 0.0 }
0x147e   :  { %v1700_v24 = vadd.f32 %v1699_v23, %v1698_v26  ;;  %v1706_v25 = vrot.slane %v1705_v6, 4  ;;  %v2239_v26 = vld [vmem:[#allocation19 + $0x1] ss:$0 sm:$0xff] }
0x1480   :  { %v1701_v27 = vrot.slane %v1700_v24, 2  ;;  %v1707_v28 = vadd.f32 %v1706_v25, %v1705_v6 }
0x1482   :  { %v1702_v7 = vadd.f32 %v1701_v27, %v1700_v24  ;;  %v1708_v29 = vrot.slane %v1707_v28, 2 }
0x1484   :  { %v1703_v36 = vrot.slane %v1702_v7, 1  ;;  %v1709_v30 = vadd.f32 %v1708_v29, %v1707_v28 }
0x1486   :  { %v1704_v31 = vadd.f32 %v1703_v36, %v1702_v7  ;;  %v1710_v32 = vrot.slane %v1709_v30, 1 }
0x1488   :  { %v1719_v33 = vpack.c.bf16 %v1704_v31, %v1704_v31  ;;  %v1711_v43 = vadd.f32 %v1710_v32, %v1709_v30  ;;  %v2574_v31 = vld [vmem:[%s3728_s24] sm:$0xff]   ;;  %v2575_v32 = vld [vmem:[%s3728_s24 + $0x8] sm:$0xff]   ;;  %s2960_s24 = smov [#allocation23]  }
0x148a   :  { %v1720_v34 = vpack.c.bf16 %v1711_v43, %v1711_v43  ;;  %v1729_v35 = vunpack.c.l.b16 %v1719_v33 }
0x148c   :  { %v1730_v37 = vunpack.c.l.b16 %v1720_v34 }
0x148e   :  { %v1731_v38 = vsel %vm540_vm4, %v1730_v37, %v1729_v35  ;;  %v2248_v37 = vld [vmem:[#allocation20 + $0x1] ss:$0 sm:$0xff] }
0x148f   :  { %v1732_v39 = vpack.c.b16 %v1731_v38, %v1731_v38 }
0x1491   :  { %2476 = vmatmul.mubr.msk.bf16.vlgmr.msra.gmra.mrb[24].mxu0 %vm287_vm1, %v1732_v39  ;;  %v2249_v39 = vld [vmem:[#allocation22 + $0x1] ss:$0 sm:$0xff] }
0x1492   :  { %2503 = vmatprep.mubr.msk.bf16.mxu0 %vm2956_vm0, %v2955_v0  ;;  %2488 = vmatpush3.bf16.msra.mxu0 %v2566_v52 }
0x1493   :  { %2489 = vmatprep.subr.bf16.mxu0 %v2955_v0 }
0x1496   :  { %2490 = vmatpush3.bf16.msra.mxu0 %v2567_v53 }
0x1497   :  { %2491 = vmatprep.subr.bf16.mxu0 %v2955_v0 }
0x149a   :  { %2492 = vmatpush3.bf16.msra.mxu0 %v2568_v16 }
0x149b   :  { %2493 = vmatprep.subr.bf16.mxu0 %v2955_v0 }
0x149e   :  { %2494 = vmatpush3.bf16.msra.mxu0 %v2569_v54 }
0x149f   :  { %2495 = vmatprep.subr.bf16.mxu0 %v2955_v0 }
0x14a2   :  { %2496 = vmatpush3.bf16.msra.mxu0 %v2570_v55 }
0x14a3   :  { %2497 = vmatprep.subr.bf16.mxu0 %v2955_v0 }
0x14a6   :  { %2498 = vmatpush3.bf16.msra.mxu0 %v2571_v48 }
0x14a7   :  { %2499 = vmatprep.subr.bf16.mxu0 %v2955_v0 }
0x14aa   :  { %2500 = vmatpush3.bf16.msra.mxu0 %v2572_v20 }
0x14ab   :  { %2501 = vmatprep.subr.bf16.mxu0 %v2955_v0 }
0x14ae   :  { %2502 = vmatpush3.bf16.msra.mxu0 %v2573_v62 }
0x1564   :  { %v1782_v41 = vpop.f32.mrb[24].mxu0 }
0x1565   :  { %v1783_v22 = vadd.f32 %v2209_v40, %v1782_v41  ;;  %v2477_v42 = vpop.f32.mrb[25].mxu0 }
0x1566   :  { %v1785_v44 = vpop.f32.mrb[26].mxu0  ;;  %v2250_v42 = vld [vmem:[%s3729_s25] ss:$0 sm:$0xff]  ;;  %s2122_s25 = sshll.u32 %s2960_s24, 4  ;;  %s2123_s25 = int_to_ptr.vmem [resolvable:$true] %s2122_s25 }
0x1567   :  { %v2478_v45 = vpop.f32.mrb[27].mxu0  ;;  %v1788_v14 = vadd.f32 %v1783_v22, %v3580_v4  ;;  %v2565_v4 = vld [vmem:[%s3722_s18 + $0x18] sm:$0xff]   ;;  %s2902_s3 = scalar_lea.vmem %s2123_s25, 32  ;;  %p2907_p7 = scmp.lt.s32.totalorder %s2123_s25, %s2123_s25 }
0x1568   :  { %2482 = vmatpush3.bf16.msra.mxu1 %v2565_v4  ;;  %p2903_p6 = scmp.ne.s32.totalorder %s2123_s25, %s2902_s3  ;;  %p2908_p8 = scmp.lt.s32.totalorder %s2902_s3, %s2902_s3 }
0x1569   :  { %v1793_v15 = vsel %vm607_vm5, %v1788_v14, 0.0  ;;  %2507 = vmatprep.subr.bf16.mxu1 %v2955_v0 }
0x156a   :  { %1794 = vadd.xlane.f32.xlu1 %v1793_v15  ;;  %p2909_p9 = por %p2908_p8, %p2907_p7 }
0x156c   :  { %p2910_p10 = pnand %p2909_p9, %p2903_p6 }
0x15f7   :  { %v1795_v46 = vpop.xlane.xlu1 %1794 }
0x15f8   :  { %v1796_v47 = vmul.f32 0.03125, %v1795_v46 }
0x15fa   :  { %v1797_v49 = vsub.f32 %v1788_v14, %v1796_v47 }
0x15fc   :  { %v1798_v50 = vmul.f32 %v1797_v49, %v1797_v49 }
0x15fe   :  { %v1799_v8 = vsel %vm607_vm5, %v1798_v50, 0.0 }
0x15ff   :  { %1800 = vadd.xlane.f32.xlu0 %v1799_v8 }
0x168c   :  { %v1801_v56 = vpop.xlane.xlu0 %1800 }
0x168d   :  { %v1802_v57 = vmul.f32 0.03125, %v1801_v56 }
0x168f   :  { %v1803_v58 = vadd.f32 1e-05, %v1802_v57 }
0x1691   :  { %2608 = vrsqrt.f32 %v1803_v58 }
0x169b   :  { %v2609_v3 = vpop.eup %2608 }
0x169c   :  { %v1805_v59 = vmul.f32 %v2609_v3, %v1797_v49 }
0x169e   :  { %v1812_v2 = vmul.f32 %v2213_v1, %v1805_v59 }
0x16a0   :  { %v1819_v61 = vadd.f32 %v2214_v60, %v1812_v2 }
0x16a2   :  { %v1827_v18 = vpack.c.bf16 %v1819_v61, %v1819_v61 }
0x16a4   :  { %2484 = vmatmul.mubr.msk.bf16.vlgmr.msra.gmra.mrb[44].mxu1 %vm287_vm1, %v1827_v18 }
0x16a5   :  { %2511 = vmatprep.mubr.msk.bf16.mxu1 %vm2956_vm0, %v2955_v0  ;;  %2508 = vmatpush3.bf16.msra.mxu1 %v2574_v31 }
0x16a6   :  { %2509 = vmatprep.subr.bf16.mxu1 %v2955_v0 }
0x16a9   :  { %2510 = vmatpush3.bf16.msra.mxu1 %v2575_v32 }
0x1777   :  { %v1883_v5 = vpop.f32.mrb[44].mxu1 }
0x1778   :  { %v1884_v9 = vadd.f32 %v2219_v63, %v1883_v5  ;;  %v2485_v11 = vpop.f32.mrb[45].mxu1 }
0x1779   :  { %v1886_v12 = vpop.f32.mrb[46].mxu1 }
0x177a   :  { %v1889_v13 = vmax.f32 %v1884_v9, 0.0  ;;  %v2486_v17 = vpop.f32.mrb[47].mxu1 }
0x177c   :  { %v1909_v10 = vpack.c.bf16 %v1889_v13, %v1889_v13 }
0x177e   :  { %2504 = vmatmul.mubr.bf16.vlgmr.msra.gmra.mrb[28].mxu0 %v1909_v10 }
0x1851   :  { %v1998_v19 = vpop.f32.mrb[28].mxu0 }
0x1852   :  { %v1999_v21 = vadd.f32 %v2239_v26, %v1998_v19  ;;  %v2505_v23 = vpop.f32.mrb[29].mxu0 }
0x1853   :  { %v2001_v6 = vpop.f32.mrb[30].mxu0 }
0x1854   :  { %v2506_v24 = vpop.f32.mrb[31].mxu0  ;;  %v2004_v25 = vadd.f32 %v1999_v21, %v1819_v61 }
0x1856   :  { %v2009_v27 = vsel %vm607_vm5, %v2004_v25, 0.0 }
0x1857   :  { %2010 = vadd.xlane.f32.xlu1 %v2009_v27 }
0x18e4   :  { %v2011_v28 = vpop.xlane.xlu1 %2010 }
0x18e5   :  { %v2012_v7 = vmul.f32 0.03125, %v2011_v28 }
0x18e7   :  { %v2013_v29 = vsub.f32 %v2004_v25, %v2012_v7 }
0x18e9   :  { %v2014_v36 = vmul.f32 %v2013_v29, %v2013_v29 }
0x18eb   :  { %v2015_v30 = vsel %vm607_vm5, %v2014_v36, 0.0 }
0x18ec   :  { %2016 = vadd.xlane.f32.xlu1 %v2015_v30 }
0x1979   :  { %v2017_v33 = vpop.xlane.xlu1 %2016 }
0x197a   :  { %v2018_v43 = vmul.f32 0.03125, %v2017_v33 }
0x197c   :  { %v2019_v34 = vadd.f32 1e-05, %v2018_v43 }
0x197e   :  { %2610 = vrsqrt.f32 %v2019_v34 }
0x1988   :  { %v2611_v35 = vpop.eup %2610 }
0x1989   :  { %v2021_v38 = vmul.f32 %v2611_v35, %v2013_v29 }
0x198b   :  { %v2028_v40 = vmul.f32 %v2248_v37, %v2021_v38 }
0x198d   :  { %v2035_v41 = vadd.f32 %v2249_v39, %v2028_v40 }
0x198f   :  { %v2041_v22 = vpack.c.bf16 %v2035_v41, %v2035_v41 }
0x1991   :  { %2512 = vmatmul.mubr.msk.bf16.vlgmr.msra.gmra.mrb[48].mxu1 %vm287_vm1, %v2041_v22 }
0x1a64   :  { %v2097_v44 = vpop.f32.mrb[48].mxu1 }
0x1a65   :  { %v2098_v0 = vadd.f32 %v2250_v42, %v2097_v44  ;;  %v2513_v45 = vpop.f32.mrb[49].mxu1 }
0x1a66   :  { %v2100_v14 = vpop.f32.mrb[50].mxu1 }
0x1a67   :  { %v2514_v15 = vpop.f32.mrb[51].mxu1  ;;  %v2103_v46 = vsel %vm456_vm2, %v2098_v0, -inf }
0x1a68   :  { %2104 = vmax.xlane.f32.xlu0 %v2103_v46 }
0x1af5   :  { %v2105_v47 = vpop.xlane.xlu0 %2104 }
0x1af6   :  { %v2106_v49 = vsub.f32 %v2098_v0, %v2105_v47 }
0x1af8   :  { %v2107_v50 = vmul.f32 1.442695, %v2106_v49 }
0x1afa   :  { %2612 = vpow2.f32 %v2107_v50 }
0x1b04   :  { %v2613_v8 = vpop.eup %2612 }
0x1b05   :  { %v2109_v51 = vsel %vm456_vm2, %v2613_v8, 0.0 }
0x1b06   :  { %2110 = vadd.xlane.f32.xlu1 %v2109_v51 }
0x1b93   :  { %v2111_v4 = vpop.xlane.xlu1 %2110 }
0x1b94   :  { %2614 = vlog2.f32 %v2111_v4 }
0x1b9e   :  { %v2615_v52 = vpop.eup %2614 }
0x1b9f   :  { %v2113_v53 = vmul.f32 0.6931472, %v2615_v52 }
0x1ba1   :  { %v2114_v16 = vsub.f32 %v2106_v49, %v2113_v53 }
0x1ba3   :  { %2115 = vst [vmem:[#allocation23] sm:$0x3] %v2114_v16 }
0x1ba4   :  { %2913 = shalt.err (!%p2910_p10)
}
0x1ba5   :  { %s2914_s11 = scalar_lea.hbm %s3730_s26, 32 }
0x1ba6   :  { %p2915_p11 = scmp.ne.s32.totalorder %s3730_s26, %s2914_s11  ;;  %p2918_p12 = scmp.lt.u32.totalorder %s2914_s11, %s3730_s26 }
0x1ba8   :  { %p2920_p13 = pnand %p2918_p12, %p2915_p11 }
0x1baa   :  { %2923 = shalt.err (!%p2920_p13)
}
0x1bab   :  { %2125 = dma.vmem_to_hbm [thread:$0]  %s2123_s25, 32, %s3730_s26, [#allocation4]  }
0x1bac   :  { %2938 = dma.done.wait [#allocation4], 32  }
0x1bad   :  { %2939 = vsyncadd [#allocation4], 4294967264 }
0x1bae   :  { %2129 = vsyncpa [#allocation3], 1 }
0x1baf   :  { %2130 = vsyncpa [#allocation6], 1 }
0x1bb0   :  { %2131 = vsyncpa [#allocation9], 1 }
0x1bb1   :  { %2132 = vsyncpa [#allocation12], 1 }
0x1bb2   :  { %2133 = vsyncpa [#allocation15], 1 }
0x1bb3   :  { %2134 = vsyncpa [#allocation18], 1 }
0x1bb4   :  { %2135 = vsyncpa [#allocation21], 1 }
0x1bb5   :  { %2136 = vsyncpa [#allocation4], 1 }

</bundles_post_ra>
